<compile_context>
chip_gen: v7x
topology: tpu7x:2x2x1
jax: 0.10.0
libtpu: 0.0.40
codegen_flags: <defaults>
</compile_context>

<pallas_src>
import functools
import math

import jax
import jax.numpy as jnp
from jax.experimental import pallas as pl
from jax.experimental.pallas import tpu as pltpu

_EPS = float(jnp.finfo(jnp.float32).eps)   # F.rms_norm(eps=None) on float32
_NEG_INF = -1e30


def _round_up(a, b):
    return (a + b - 1) // b * b


def _pick_divisor_tile(dim, target, align=128):
    """Largest multiple of `align` that divides `dim` and is <= target (or dim)."""
    if dim <= target:
        return dim
    t = (target // align) * align
    while t >= align:
        if dim % t == 0:
            return t
        t -= align
    return dim


def _fit_tile(target, m_pad):
    """Largest multiple of 128 <= target that divides m_pad (else m_pad)."""
    t = min(target, m_pad)
    t = (t // 128) * 128
    while t >= 128:
        if m_pad % t == 0:
            return t
        t -= 128
    return m_pad


def _pad_rows(x2d, m_pad):
    m = x2d.shape[0]
    if m_pad == m:
        return x2d
    return jnp.pad(x2d, ((0, m_pad - m), (0, 0)))


@functools.lru_cache(maxsize=1)
def _tpu_config():
    """Per-generation tiles + VMEM limit (review: blk=256 on v6e/v7x, lower
    vmem cap on v7x's 64 MiB, bigger row tiles on 128 MiB chips)."""
    kind = ""
    try:
        kind = jax.devices()[0].device_kind.lower()
    except Exception:
        pass
    vmem_cap = None
    try:
        vmem_cap = int(pltpu.get_tpu_info().vmem_capacity_bytes)
    except Exception:
        pass
    mib = 1024 * 1024
    cfg = dict(attn_blk=128, mm_tm=256, mm_tn=512, mm_tk=512,
               mlp_tm=256, mlp_th=512, vmem_limit=None)      # safe fallback
    if ("v5e" in kind) or ("v5 lite" in kind) or ("v5lite" in kind):
        # 128-wide MXU, single store slot, 128 MiB VMEM.
        cfg.update(attn_blk=128, mm_tm=512, mlp_tm=128, mlp_th=256,
                   vmem_limit=100 * mib)
    elif ("v6" in kind) or ("trillium" in kind):
        cfg.update(attn_blk=256, mm_tm=512, mlp_tm=512, mlp_th=512,
                   vmem_limit=100 * mib)
    elif "v7" in kind:
        # 64 MiB physical VMEM -> leave headroom for Mosaic internal scratch.
        cfg.update(attn_blk=256, mm_tm=256, mlp_tm=256, mlp_th=512,
                   vmem_limit=48 * mib)
    if vmem_cap is not None and cfg["vmem_limit"] is not None:
        cfg["vmem_limit"] = max(32 * mib,
                                min(cfg["vmem_limit"], vmem_cap - 16 * mib))
    return cfg


# --------------------------------------------------------------------------
# Kernel 1: fused residual-mix + rms_norm + QKV projection
#   qkv = rms_norm(l0*x + l1*x0) @ Wqkv_t     (xn cached in VMEM across N tiles)
# --------------------------------------------------------------------------
def _mix_norm_matmul_kernel(lam_ref, x_ref, x0_ref, w_ref, o_ref, xn_ref):
    j = pl.program_id(1)

    @pl.when(j == 0)
    def _init():
        xm = (lam_ref[0] * x_ref[...].astype(jnp.float32)
              + lam_ref[1] * x0_ref[...].astype(jnp.float32))
        ms = jnp.mean(xm * xm, axis=-1, keepdims=True)
        xn_ref[...] = (xm * jax.lax.rsqrt(ms + _EPS)).astype(xn_ref.dtype)

    o_ref[...] = jnp.dot(xn_ref[...], w_ref[...],
                         preferred_element_type=jnp.float32).astype(o_ref.dtype)


def mix_norm_qkv(x2d, x0_2d, lambdas, w_t, *, tm, tn, vmem_limit):
    M, D = x2d.shape
    Dw, N = w_t.shape
    assert Dw == D and M % tm == 0
    w_t = w_t.astype(x2d.dtype)               # CastedLinear cast, once, outside
    tn = _pick_divisor_tile(N, tn)
    cost = pl.CostEstimate(
        flops=2 * M * D * N, transcendentals=0,
        bytes_accessed=(2 * M * D + (M // tm) * D * N + M * N)
        * x2d.dtype.itemsize)
    return pl.pallas_call(
        _mix_norm_matmul_kernel,
        out_shape=jax.ShapeDtypeStruct((M, N), x2d.dtype),
        grid=(M // tm, N // tn),
        in_specs=[
            pl.BlockSpec(memory_space=pltpu.MemorySpace.SMEM),   # lambdas (2,)
            pl.BlockSpec((tm, D), lambda i, j: (i, 0)),
            pl.BlockSpec((tm, D), lambda i, j: (i, 0)),
            pl.BlockSpec((D, tn), lambda i, j: (0, j)),
        ],
        out_specs=pl.BlockSpec((tm, tn), lambda i, j: (i, j)),
        scratch_shapes=[pltpu.VMEM((tm, D), x2d.dtype)],
        compiler_params=pltpu.CompilerParams(
            dimension_semantics=("parallel", "arbitrary"),
            vmem_limit_bytes=vmem_limit),
        cost_estimate=cost,
    )(lambdas.astype(jnp.float32), x2d, x0_2d, w_t)


# --------------------------------------------------------------------------
# Kernel 2: fused QKV post-processing (v/vi mix, per-head rms_norm, RoPE),
# lane-dense (T, D) layout, single memory pass.
# --------------------------------------------------------------------------
def _qkv_prep_kernel(lamb_ref, qkv_ref, vi_ref, cos_ref, sin_ref,
                     q_ref, k_ref, v_ref, *, nh, hd, D):
    cos = cos_ref[...]          # (tm, hd//2) f32
    sin = sin_ref[...]
    lamb = lamb_ref[0]
    half = hd // 2

    def norm_rope(x):
        x = x.astype(jnp.float32)
        ms = jnp.mean(x * x, axis=-1, keepdims=True)
        xn = x * jax.lax.rsqrt(ms + _EPS)
        x1 = xn[:, :half]
        x2 = xn[:, half:]
        y1 = x1 * cos + x2 * sin
        y2 = -x1 * sin + x2 * cos
        return jnp.concatenate([y1, y2], axis=-1)

    q_heads, k_heads = [], []
    for h in range(nh):
        lo = h * hd
        q_heads.append(norm_rope(qkv_ref[:, lo:lo + hd]))
        k_heads.append(norm_rope(qkv_ref[:, D + lo:D + lo + hd]))
    q_ref[...] = jnp.concatenate(q_heads, axis=-1).astype(q_ref.dtype)
    k_ref[...] = jnp.concatenate(k_heads, axis=-1).astype(k_ref.dtype)
    v = qkv_ref[:, 2 * D:3 * D].astype(jnp.float32)
    v_ref[...] = ((1.0 - lamb) * v
                  + lamb * vi_ref[...].astype(jnp.float32)).astype(v_ref.dtype)


def qkv_prep(qkv, vi2d, lamb, cos, sin, *, nh, hd, tm, vmem_limit):
    M, N3 = qkv.shape
    D = N3 // 3
    assert M % tm == 0
    kernel = functools.partial(_qkv_prep_kernel, nh=nh, hd=hd, D=D)
    out_shape = tuple(jax.ShapeDtypeStruct((M, D), qkv.dtype) for _ in range(3))
    out_specs = tuple(pl.BlockSpec((tm, D), lambda i: (i, 0)) for _ in range(3))
    return pl.pallas_call(
        kernel,
        out_shape=out_shape,
        grid=(M // tm,),
        in_specs=[
            pl.BlockSpec(memory_space=pltpu.MemorySpace.SMEM),   # lamb (1,)
            pl.BlockSpec((tm, 3 * D), lambda i: (i, 0)),
            pl.BlockSpec((tm, D), lambda i: (i, 0)),
            pl.BlockSpec((tm, hd // 2), lambda i: (i, 0)),
            pl.BlockSpec((tm, hd // 2), lambda i: (i, 0)),
        ],
        out_specs=out_specs,
        compiler_params=pltpu.CompilerParams(
            dimension_semantics=("parallel",),
            vmem_limit_bytes=vmem_limit),
    )(jnp.reshape(lamb, (1,)).astype(jnp.float32), qkv, vi2d, cos, sin)


# --------------------------------------------------------------------------
# Kernel 3: causal flash attention in (T, D) layout.
#   - K/V index maps clamped at the diagonal -> no DMA for masked tiles
#   - iota mask only on diagonal tiles
#   - per-head online softmax, lane-dense (blk, D) output store
# --------------------------------------------------------------------------
def _flash_attn_kernel(q_ref, k_ref, v_ref, o_ref, m_sc, l_sc, acc_sc, *,
                       sm_scale, blk, nh, hd):
    qi = pl.program_id(0)
    ki = pl.program_id(1)

    @pl.when(ki == 0)
    def _init():
        m_sc[...] = jnp.full_like(m_sc, _NEG_INF)
        l_sc[...] = jnp.zeros_like(l_sc)
        acc_sc[...] = jnp.zeros_like(acc_sc)

    def online_softmax_step(masked):
        if masked:
            row = jax.lax.broadcasted_iota(jnp.int32, (blk, blk), 0)
            col = jax.lax.broadcasted_iota(jnp.int32, (blk, blk), 1)
            causal = row >= col          # same-tile diagonal (qi == ki)
        for h in range(nh):
            lo = h * hd
            qh = q_ref[:, lo:lo + hd]
            kh = k_ref[:, lo:lo + hd]
            vh = v_ref[:, lo:lo + hd]
            s = jax.lax.dot_general(qh, kh, (((1,), (1,)), ((), ())),
                                    preferred_element_type=jnp.float32)
            s = s * sm_scale
            if masked:
                s = jnp.where(causal, s, _NEG_INF)
            m_prev = m_sc[h]
            m_new = jnp.maximum(m_prev, jnp.max(s, axis=-1, keepdims=True))
            alpha = jnp.exp(m_prev - m_new)
            p = jnp.exp(s - m_new)
            l_sc[h] = alpha * l_sc[h] + jnp.sum(p, axis=-1, keepdims=True)
            acc_sc[h] = alpha * acc_sc[h] + jnp.dot(
                p.astype(vh.dtype), vh, preferred_element_type=jnp.float32)
            m_sc[h] = m_new

    @pl.when(ki < qi)                    # interior tiles: no mask needed
    def _interior():
        online_softmax_step(masked=False)

    @pl.when(ki == qi)                   # diagonal tile: mask + finalize
    def _diag_finalize():
        online_softmax_step(masked=True)
        outs = []
        for h in range(nh):
            l = l_sc[h]
            inv = pl.reciprocal(l, approx=True)
            inv = inv * (2.0 - l * inv)  # one Newton step -> full f32 accuracy
            outs.append(acc_sc[h] * inv)
        o_ref[...] = jnp.concatenate(outs, axis=-1).astype(o_ref.dtype)


def flash_attention_causal(q2d, k2d, v2d, *, nh, hd, blk, vmem_limit):
    """q2d/k2d/v2d: (M, D) lane-dense, M % blk == 0.  Causal, scale=1/sqrt(hd)."""
    M, D = q2d.shape
    assert M % blk == 0 and nh * hd == D
    nblk = M // blk
    kernel = functools.partial(_flash_attn_kernel, sm_scale=1.0 / math.sqrt(hd),
                               blk=blk, nh=nh, hd=hd)
    cost = pl.CostEstimate(
        flops=2 * M * M * D,                     # ~causal half of 4*M*M*D
        transcendentals=nh * M * M // 2,
        bytes_accessed=4 * M * D * q2d.dtype.itemsize)
    return pl.pallas_call(
        kernel,
        out_shape=jax.ShapeDtypeStruct((M, D), q2d.dtype),
        grid=(nblk, nblk),
        in_specs=[
            pl.BlockSpec((blk, D), lambda i, j: (i, 0)),
            # Clamp at the diagonal: blocks with j > i repeat index i and are
            # never re-fetched -> masked tiles cost zero HBM traffic.
            pl.BlockSpec((blk, D), lambda i, j: (jnp.minimum(i, j), 0)),
            pl.BlockSpec((blk, D), lambda i, j: (jnp.minimum(i, j), 0)),
        ],
        out_specs=pl.BlockSpec((blk, D), lambda i, j: (i, 0)),
        scratch_shapes=[
            pltpu.VMEM((nh, blk, 1), jnp.float32),   # m
            pltpu.VMEM((nh, blk, 1), jnp.float32),   # l
            pltpu.VMEM((nh, blk, hd), jnp.float32),  # acc
        ],
        compiler_params=pltpu.CompilerParams(
            dimension_semantics=("parallel", "arbitrary"),
            vmem_limit_bytes=vmem_limit),
        cost_estimate=cost,
    )(q2d, k2d, v2d)


# --------------------------------------------------------------------------
# Kernel 4: generic tiled matmul with f32 accumulator (attention out-proj)
# --------------------------------------------------------------------------
def _matmul_kernel(x_ref, w_ref, o_ref, acc_ref):
    k = pl.program_id(2)

    @pl.when(k == 0)
    def _init():
        acc_ref[...] = jnp.zeros_like(acc_ref)

    acc_ref[...] += jnp.dot(x_ref[...], w_ref[...],
                            preferred_element_type=jnp.float32)

    @pl.when(k == pl.num_programs(2) - 1)
    def _fin():
        o_ref[...] = acc_ref[...].astype(o_ref.dtype)


def linear(x2d, w_t, *, tm, tn, tk, vmem_limit):
    """x2d: (M, K), w_t: (K, N) pre-transposed weight.  M % tm == 0."""
    M, K = x2d.shape
    Kw, N = w_t.shape
    assert Kw == K and M % tm == 0
    w_t = w_t.astype(x2d.dtype)
    tn = _pick_divisor_tile(N, tn)
    tk = _pick_divisor_tile(K, tk)
    cost = pl.CostEstimate(
        flops=2 * M * K * N, transcendentals=0,
        bytes_accessed=(M * K + (M // tm) * K * N + M * N) * x2d.dtype.itemsize)
    return pl.pallas_call(
        _matmul_kernel,
        out_shape=jax.ShapeDtypeStruct((M, N), x2d.dtype),
        grid=(M // tm, N // tn, K // tk),
        in_specs=[
            pl.BlockSpec((tm, tk), lambda i, j, k: (i, k)),
            pl.BlockSpec((tk, tn), lambda i, j, k: (k, j)),
        ],
        out_specs=pl.BlockSpec((tm, tn), lambda i, j, k: (i, j)),
        scratch_shapes=[pltpu.VMEM((tm, tn), jnp.float32)],
        compiler_params=pltpu.CompilerParams(
            dimension_semantics=("parallel", "parallel", "arbitrary"),
            vmem_limit_bytes=vmem_limit),
        cost_estimate=cost,
    )(x2d, w_t)


# --------------------------------------------------------------------------
# Kernel 5: fused  a + MLP(rms_norm(a))  with hidden-dim tiling + f32 acc
# --------------------------------------------------------------------------
def _block_mlp_kernel(a_ref, wfc_ref, wproj_ref, o_ref, acc_ref, xn_ref):
    h = pl.program_id(1)

    @pl.when(h == 0)
    def _init():
        a = a_ref[...].astype(jnp.float32)
        ms = jnp.mean(a * a, axis=-1, keepdims=True)
        xn_ref[...] = (a * jax.lax.rsqrt(ms + _EPS)).astype(xn_ref.dtype)
        acc_ref[...] = jnp.zeros_like(acc_ref)

    hh = jnp.dot(xn_ref[...], wfc_ref[...], preferred_element_type=jnp.float32)
    hh = jnp.maximum(hh, 0.0)
    hh = hh * hh
    acc_ref[...] += jnp.dot(hh.astype(wproj_ref.dtype), wproj_ref[...],
                            preferred_element_type=jnp.float32)

    @pl.when(h == pl.num_programs(1) - 1)
    def _fin():
        o_ref[...] = (a_ref[...].astype(jnp.float32)
                      + acc_ref[...]).astype(o_ref.dtype)


def block_mlp(a2d, wfc_t, wproj_t, *, tm, th, vmem_limit):
    """Returns a2d + relu(rms_norm(a2d) @ Wfc)^2 @ Wproj.   M % tm == 0."""
    M, D = a2d.shape
    Dw, H = wfc_t.shape
    assert Dw == D and wproj_t.shape == (H, D) and M % tm == 0
    wfc_t = wfc_t.astype(a2d.dtype)
    wproj_t = wproj_t.astype(a2d.dtype)
    th = _pick_divisor_tile(H, th)
    cost = pl.CostEstimate(
        flops=4 * M * D * H, transcendentals=0,
        bytes_accessed=(2 * M * D + 2 * (M // tm) * D * H) * a2d.dtype.itemsize)
    return pl.pallas_call(
        _block_mlp_kernel,
        out_shape=jax.ShapeDtypeStruct((M, D), a2d.dtype),
        grid=(M // tm, H // th),
        in_specs=[
            pl.BlockSpec((tm, D), lambda i, h: (i, 0)),
            pl.BlockSpec((D, th), lambda i, h: (0, h)),
            pl.BlockSpec((th, D), lambda i, h: (h, 0)),
        ],
        out_specs=pl.BlockSpec((tm, D), lambda i, h: (i, 0)),
        scratch_shapes=[pltpu.VMEM((tm, D), jnp.float32),
                        pltpu.VMEM((tm, D), a2d.dtype)],
        compiler_params=pltpu.CompilerParams(
            dimension_semantics=("parallel", "arbitrary"),
            vmem_limit_bytes=vmem_limit),
        cost_estimate=cost,
    )(a2d, wfc_t, wproj_t)


# --------------------------------------------------------------------------
# Element-wise helpers used by the pure-JAX reference
# --------------------------------------------------------------------------
def _rms_norm(x):
    x32 = x.astype(jnp.float32)
    ms = jnp.mean(x32 * x32, axis=-1, keepdims=True)
    return (x32 * jax.lax.rsqrt(ms + _EPS)).astype(x.dtype)


def _rotary_tables(T, hd, base=10000.0):
    inv_freq = (1.0 / base) ** (jnp.arange(0, hd, 2, dtype=jnp.float32) / hd)
    freqs = jnp.outer(jnp.arange(T, dtype=jnp.float32), inv_freq)   # (T, hd/2)
    return jnp.cos(freqs), jnp.sin(freqs)


def _apply_rotary(x, cos, sin):
    # x: (T, nh, hd)
    x1, x2 = jnp.split(x, 2, axis=-1)
    c = cos[:, None, :]
    s = sin[:, None, :]
    y1 = x1 * c + x2 * s
    y2 = -x1 * s + x2 * c
    return jnp.concatenate([y1, y2], axis=-1).astype(x.dtype)


# --------------------------------------------------------------------------
# Block forward (Pallas pipeline)
# --------------------------------------------------------------------------
def block_forward(x, vi, x0, params):
    """x, x0: (1, T, D); vi: (1, T, nh, hd) or None."""
    B, T, D = x.shape
    assert B == 1
    nh = params["n_head"]
    hd = D // nh
    cfg = _tpu_config()
    vmem_limit = cfg["vmem_limit"]

    # Pad rows ONCE; every kernel below assumes tile-divisible M.
    m_pad = _round_up(T, 128)
    mm_tm = _fit_tile(cfg["mm_tm"], m_pad)
    mlp_tm = _fit_tile(cfg["mlp_tm"], m_pad)
    blk = _fit_tile(cfg["attn_blk"], m_pad)

    x2d = _pad_rows(x.reshape(T, D), m_pad)
    x0_2d = _pad_rows(x0.reshape(T, D), m_pad)

    # 1+2) fused residual mix + rms_norm + QKV projection
    qkv = mix_norm_qkv(x2d, x0_2d, params["lambdas"], params["wqkv_t"],
                       tm=mm_tm, tn=cfg["mm_tn"], vmem_limit=vmem_limit)

    # 3) fused v/vi mix + per-head rms_norm + rotary (lane-dense (T, D) layout)
    cos, sin = _rotary_tables(m_pad, hd)
    if vi is None:
        vi2d = jnp.zeros((m_pad, D), x2d.dtype)        # lamb=0 => v unchanged
        lamb = jnp.float32(0.0)
    else:
        vi2d = _pad_rows(vi.reshape(T, D).astype(x2d.dtype), m_pad)
        lamb = params["lamb"]
    q2d, k2d, v2d = qkv_prep(qkv, vi2d, lamb, cos, sin, nh=nh, hd=hd,
                             tm=mm_tm, vmem_limit=vmem_limit)

    # 4) causal flash attention (Pallas), no head transposes needed
    # TODO(synk): only the standard causal BlockMask is supported; arbitrary
    # flex_attention score_mod / BlockMask are not translated.
    y2d = flash_attention_causal(q2d, k2d, v2d, nh=nh, hd=hd, blk=blk,
                                 vmem_limit=vmem_limit)

    # 5) attention output projection (Pallas tiled matmul)
    a = linear(y2d, params["wo_t"], tm=mm_tm, tn=cfg["mm_tn"], tk=cfg["mm_tk"],
               vmem_limit=vmem_limit)

    # 6) fused residual + rms_norm + MLP (Pallas)
    out = block_mlp(a, params["wfc_t"], params["wproj_t"],
                    tm=mlp_tm, th=cfg["mlp_th"], vmem_limit=vmem_limit)
    return out[:T].reshape(B, T, D)


# --------------------------------------------------------------------------
# Pure-JAX reference (mirrors the PyTorch Block forward)
# --------------------------------------------------------------------------
def block_reference(x, vi, x0, params):
    B, T, D = x.shape
    nh = params["n_head"]
    hd = D // nh
    lamb = params["lamb"]

    xm = params["lambdas"][0] * x + params["lambdas"][1] * x0
    xn = _rms_norm(xm).reshape(T, D)
    qkv = xn @ params["wqkv_t"].astype(xn.dtype)
    q, k, v = jnp.split(qkv, 3, axis=-1)
    q = q.reshape(T, nh, hd)
    k = k.reshape(T, nh, hd)
    v = v.reshape(T, nh, hd)
    vi_h = v if vi is None else vi.reshape(T, nh, hd).astype(v.dtype)
    v = (1.0 - lamb) * v + lamb * vi_h
    cos, sin = _rotary_tables(T, hd)
    q = _apply_rotary(_rms_norm(q), cos, sin)
    k = _apply_rotary(_rms_norm(k), cos, sin)

    s = jnp.einsum("qhd,khd->hqk", q.astype(jnp.float32),
                   k.astype(jnp.float32)) / math.sqrt(hd)
    mask = jnp.tril(jnp.ones((T, T), dtype=bool))
    s = jnp.where(mask[None, :, :], s, -jnp.inf)
    p = jax.nn.softmax(s, axis=-1)
    y = jnp.einsum("hqk,khd->qhd", p, v.astype(jnp.float32)).reshape(T, D)
    y = y.astype(x.dtype)

    a = y @ params["wo_t"].astype(y.dtype)
    an = _rms_norm(a)
    m = jnp.square(jnp.maximum(an @ params["wfc_t"].astype(an.dtype), 0.0))
    m = m @ params["wproj_t"].astype(m.dtype)
    return (a + m).reshape(B, T, D).astype(x.dtype)


def init_block_params(key, dim, n_head, dtype=jnp.float32):
    ks = jax.random.split(key, 6)

    def lin_t(k, fan_in, fan_out):
        # nn.Linear default init U(-1/sqrt(fan_in), 1/sqrt(fan_in)); stored
        # pre-transposed as (in, out).
        bound = 1.0 / math.sqrt(fan_in)
        return jax.random.uniform(k, (fan_in, fan_out), jnp.float32,
                                  minval=-bound, maxval=bound).astype(dtype)

    wq = lin_t(ks[0], dim, dim)
    wk = lin_t(ks[1], dim, dim)
    wv = lin_t(ks[2], dim, dim)
    # The module zero-inits the MLP c_proj; use a small non-zero weight here so
    # the test exercises the full second-matmul path.
    wproj_t = (0.02 * jax.random.normal(ks[5], (4 * dim, dim),
                                        jnp.float32)).astype(dtype)
    return dict(
        n_head=n_head,
        lambdas=jnp.array([0.7, 0.3], jnp.float32),   # module default is [1, 0]
        lamb=jnp.float32(0.5),
        wqkv_t=jnp.concatenate([wq, wk, wv], axis=1),
        wo_t=lin_t(ks[3], dim, dim),
        wfc_t=lin_t(ks[4], dim, 4 * dim),
        wproj_t=wproj_t,
    )


if __name__ == "__main__":
    jax.config.update("jax_default_matmul_precision", "highest")

    key = jax.random.PRNGKey(0)
    k_x, k_x0, k_vi, k_p = jax.random.split(key, 4)

    B, T, D, n_head = 1, 128, 128, 2
    hd = D // n_head
    x = jax.random.normal(k_x, (B, T, D), jnp.float32)
    x0 = jax.random.normal(k_x0, (B, T, D), jnp.float32)
    vi = jax.random.normal(k_vi, (B, T, n_head, hd), jnp.float32)
    params = init_block_params(k_p, D, n_head)

    # f32 test with vi
    out = jax.block_until_ready(block_forward(x, vi, x0, params))
    ref = block_reference(x, vi, x0, params)
    assert out.shape == (B, T, D)
    assert bool(jnp.allclose(out, ref, atol=3e-4, rtol=3e-4)), (
        f"max abs err {float(jnp.max(jnp.abs(out - ref)))}")

    # vi=None path (v-mix becomes the identity, matches v.clone() in the module)
    out2 = jax.block_until_ready(block_forward(x, None, x0, params))
    ref2 = block_reference(x, None, x0, params)
    assert bool(jnp.allclose(out2, ref2, atol=3e-4, rtol=3e-4))

    # ragged T (exercises the single top-level padding / final slice path;
    # same padded shapes -> reuses the compiled kernels)
    Tr = 96
    xr, x0r, vir = x[:, :Tr], x0[:, :Tr], vi[:, :Tr]
    out3 = jax.block_until_ready(block_forward(xr, vir, x0r, params))
    ref3 = block_reference(xr, vir, x0r, params)
    assert bool(jnp.allclose(out3, ref3, atol=3e-4, rtol=3e-4))

    # bf16 smoke test: matmul-heavy path in bf16 with f32 accumulators.
    bf = jnp.bfloat16
    params_bf = dict(params)
    for name in ("wqkv_t", "wo_t", "wfc_t", "wproj_t"):
        params_bf[name] = params[name].astype(bf)
    out_bf = jax.block_until_ready(
        block_forward(x.astype(bf), vi.astype(bf), x0.astype(bf), params_bf))
    assert out_bf.dtype == bf
    assert bool(jnp.all(jnp.isfinite(out_bf.astype(jnp.float32))))

    print("KERNEL_OK")
</pallas_src>

<mosaic_0001>
module attributes {stable_mosaic.version = 11 : i64} {
  func.func @_mix_norm_matmul_kernel(%arg0: i32, %arg1: i32, %arg2: memref<2xf32, #tpu.memory_space<smem>>, %arg3: memref<128x128xf32, #tpu.memory_space<vmem>>, %arg4: memref<128x128xf32, #tpu.memory_space<vmem>>, %arg5: memref<128x384xf32, #tpu.memory_space<vmem>>, %arg6: memref<128x384xf32, #tpu.memory_space<vmem>>, %arg7: memref<128x128xf32, #tpu.memory_space<vmem>>) attributes {dimension_semantics = [#tpu.dimension_semantics<parallel>, #tpu.dimension_semantics<arbitrary>], iteration_bounds = array<i64: 1, 1>, scalar_prefetch = 0 : i64, scratch_operands = 1 : i64, tpu.core_type = #tpu.core_type<tc>, window_params = [{transform_indices = @transform_0, window_bounds = array<i64: 2>}, {transform_indices = @transform_1, window_bounds = array<i64: 128, 128>}, {transform_indices = @transform_2, window_bounds = array<i64: 128, 128>}, {transform_indices = @transform_3, window_bounds = array<i64: 128, 384>}, {transform_indices = @transform_4, window_bounds = array<i64: 128, 384>}]} {
    %c0_i32 = arith.constant 0 : i32
    %0 = arith.cmpi eq, %arg1, %c0_i32 : i32
    %1 = arith.extui %0 : i1 to i32
    %c0_i32_0 = arith.constant 0 : i32
    %2 = arith.cmpi ne, %1, %c0_i32_0 : i32
    scf.if %2 {
      %c0_6 = arith.constant 0 : index
      %7 = memref.load %arg2[%c0_6] : memref<2xf32, #tpu.memory_space<smem>>
      %c0_7 = arith.constant 0 : index
      %c0_8 = arith.constant 0 : index
      %8 = vector.load %arg3[%c0_7, %c0_8] : memref<128x128xf32, #tpu.memory_space<vmem>>, vector<128x128xf32>
      %9 = vector.broadcast %7 : f32 to vector<128x128xf32>
      %10 = arith.mulf %9, %8 : vector<128x128xf32>
      %c1 = arith.constant 1 : index
      %11 = memref.load %arg2[%c1] : memref<2xf32, #tpu.memory_space<smem>>
      %c0_9 = arith.constant 0 : index
      %c0_10 = arith.constant 0 : index
      %12 = vector.load %arg4[%c0_9, %c0_10] : memref<128x128xf32, #tpu.memory_space<vmem>>, vector<128x128xf32>
      %13 = vector.broadcast %11 : f32 to vector<128x128xf32>
      %14 = arith.mulf %13, %12 : vector<128x128xf32>
      %15 = arith.addf %10, %14 : vector<128x128xf32>
      %16 = arith.mulf %15, %15 : vector<128x128xf32>
      %cst_11 = arith.constant dense<0.000000e+00> : vector<128xf32>
      %17 = vector.multi_reduction <add>, %16, %cst_11 [1] : vector<128x128xf32> to vector<128xf32>
      %18 = vector.shape_cast %17 : vector<128xf32> to vector<128x1xf32>
      %cst_12 = arith.constant 1.280000e+02 : f32
      %19 = vector.broadcast %cst_12 : f32 to vector<128x1xf32>
      %20 = arith.divf %18, %19 : vector<128x1xf32>
      %cst_13 = arith.constant 1.1920929E-7 : f32
      %21 = vector.broadcast %cst_13 : f32 to vector<128x1xf32>
      %22 = arith.addf %20, %21 : vector<128x1xf32>
      %23 = math.rsqrt %22 : vector<128x1xf32>
      %24 = vector.broadcast %23 : vector<128x1xf32> to vector<128x128xf32>
      %25 = arith.mulf %15, %24 : vector<128x128xf32>
      %c0_14 = arith.constant 0 : index
      %c0_15 = arith.constant 0 : index
      %26 = vector.load %arg7[%c0_14, %c0_15] : memref<128x128xf32, #tpu.memory_space<vmem>>, vector<128x128xf32>
      tpu.vector_store %arg7[%c0_14, %c0_15], %25 {strides = array<i32>} : memref<128x128xf32, #tpu.memory_space<vmem>>, vector<128x128xf32>,
    } else {
    }
    %c0 = arith.constant 0 : index
    %c0_1 = arith.constant 0 : index
    %3 = vector.load %arg7[%c0, %c0_1] : memref<128x128xf32, #tpu.memory_space<vmem>>, vector<128x128xf32>
    %c0_2 = arith.constant 0 : index
    %c0_3 = arith.constant 0 : index
    %4 = vector.load %arg5[%c0_2, %c0_3] : memref<128x384xf32, #tpu.memory_space<vmem>>, vector<128x384xf32>
    %cst = arith.constant dense<0.000000e+00> : vector<128x384xf32>
    %5 = tpu.matmul %3, %4, %cst {dimension_numbers = #tpu.dot_dimension_numbers<[1], [0], [0], [1], [0, 0, 1, 1], [], []>, precision = #tpu.contract_precision<fp32>} : vector<128x128xf32>, vector<128x384xf32>, vector<128x384xf32> -> vector<128x384xf32>
    %c0_4 = arith.constant 0 : index
    %c0_5 = arith.constant 0 : index
    %6 = vector.load %arg6[%c0_4, %c0_5] : memref<128x384xf32, #tpu.memory_space<vmem>>, vector<128x384xf32>
    tpu.vector_store %arg6[%c0_4, %c0_5], %5 {strides = array<i32>} : memref<128x384xf32, #tpu.memory_space<vmem>>, vector<128x384xf32>,
    return
  }
  func.func @transform_0(%arg0: i32, %arg1: i32) -> i32 {
    %c0_i32 = arith.constant 0 : i32
    %c0_i32_0 = arith.constant 0 : i32
    return %c0_i32 : i32
  }
  func.func @transform_1(%arg0: i32, %arg1: i32) -> (i32, i32) {
    %c0_i32 = arith.constant 0 : i32
    %c0_i32_0 = arith.constant 0 : i32
    return %arg0, %c0_i32 : i32, i32
  }
  func.func @transform_2(%arg0: i32, %arg1: i32) -> (i32, i32) {
    %c0_i32 = arith.constant 0 : i32
    %c0_i32_0 = arith.constant 0 : i32
    return %arg0, %c0_i32 : i32, i32
  }
  func.func @transform_3(%arg0: i32, %arg1: i32) -> (i32, i32) {
    %c0_i32 = arith.constant 0 : i32
    %c0_i32_0 = arith.constant 0 : i32
    return %c0_i32, %arg1 : i32, i32
  }
  func.func @transform_4(%arg0: i32, %arg1: i32) -> (i32, i32) {
    %c0_i32 = arith.constant 0 : i32
    return %arg0, %arg1 : i32, i32
  }
}

</mosaic_0001>

<bundles_post_ra>
// kernel: tpu_custom_call.1
= control target key start
LH: loop header
LB: loop body
LE: loop exit
PB: predicated region body
PF: predicated region fallthrough
CT: control target
= control target key end

     0   :  { %9 = vsyncpa [#allocation6], 0  ;;  %s6320_s0 = inlined_call_operand.hbm [shape: f32[2], index: 0, kind: input, shape index: {}]   ;;  %s6321_s1 = inlined_call_operand.hbm [shape: f32[128,128], index: 1, kind: input, shape index: {}]   ;;  %s6322_s2 = inlined_call_operand.hbm [shape: f32[128,128], index: 2, kind: input, shape index: {}]   ;;  %s6323_s3 = inlined_call_operand.hbm [shape: f32[128,384], index: 3, kind: input, shape index: {}]   ;;  %s6324_s4 = inlined_call_operand.hbm [shape: f32[128,384], index: 4, kind: output, shape index: {}]  }
   0x1   :  { %10 = vsyncpa [#allocation4], 0 }
   0x2   :  { %11 = vsyncpa [#allocation9], 0 }
   0x3   :  { %12 = vsyncpa [#allocation5], 0  ;;  %s4611_s15 = smov [#allocation8]   ;;  %s4612_s17 = smov [#allocation7]  }
   0x4   :  { %s38_s16 = sshll.u32 %s4611_s15, 4  ;;  %s26_s18 = sshll.u32 %s4612_s17, 4  ;;  %s39_s16 = int_to_ptr.vmem [resolvable:$true] %s38_s16  ;;  %s27_s18 = int_to_ptr.vmem [resolvable:$true] %s26_s18 }
   0x5   :  { %s4505_s21 = scalar_lea.hbm %s6322_s2, 2048 }
   0x6   :  { %p4506_p0 = scmp.ne.s32.totalorder %s6322_s2, %s4505_s21  ;;  %p4509_p1 = scmp.lt.u32.totalorder %s4505_s21, %s6322_s2 }
   0x8   :  { %p4511_p2 = pnand %p4509_p1, %p4506_p0 }
   0xa   :  { %4514 = shalt.err (!%p4511_p2)
}
   0xb   :  { %s4515_s26 = scalar_lea.vmem %s39_s16, 2048  ;;  %p4520_p4 = scmp.lt.s32.totalorder %s39_s16, %s39_s16 }
   0xc   :  { %p4516_p3 = scmp.ne.s32.totalorder %s39_s16, %s4515_s26  ;;  %p4521_p5 = scmp.lt.s32.totalorder %s4515_s26, %s4515_s26 }
   0xe   :  { %p4522_p6 = por %p4521_p5, %p4520_p4 }
  0x10   :  { %p4523_p7 = pnand %p4522_p6, %p4516_p3 }
  0x12   :  { %4526 = shalt.err (!%p4523_p7)
}
  0x13   :  { %s4613_s27 = smov 128   ;;  %s4614_s28 = smov 8  }
  0x14   :  { %44 = dma.hbm_to_vmem [thread:$0]  %s6322_s2, 2048, %s39_s16, [#allocation9], %s4613_s27, %s4613_s27, %s4614_s28  }
  0x15   :  { %s4527_s7 = scalar_lea.hbm %s6320_s0, 16 }
  0x16   :  { %p4528_p8 = scmp.ne.s32.totalorder %s6320_s0, %s4527_s7  ;;  %p4531_p9 = scmp.lt.u32.totalorder %s4527_s7, %s6320_s0 }
  0x18   :  { %p4533_p10 = pnand %p4531_p9, %p4528_p8 }
  0x1a   :  { %4536 = shalt.err (!%p4533_p10)
}
  0x1b   :  { %s4615_s12 = smov [#allocation3]   ;;  %s4537_s16 = scalar_lea.hbm %s6321_s1, 2048 }
  0x1c   :  { %20 = dma.hbm_to_smem %s6320_s0, 16, %s4615_s12, [#allocation6]  }
  0x1d   :  { %p4538_p11 = scmp.ne.s32.totalorder %s6321_s1, %s4537_s16  ;;  %p4541_p12 = scmp.lt.u32.totalorder %s4537_s16, %s6321_s1 }
  0x1f   :  { %p4543_p13 = pnand %p4541_p12, %p4538_p11 }
  0x21   :  { %4546 = shalt.err (!%p4543_p13)
}
  0x22   :  { %s4547_s22 = scalar_lea.vmem %s27_s18, 2048  ;;  %p4552_p1 = scmp.lt.s32.totalorder %s27_s18, %s27_s18 }
  0x23   :  { %p4548_p0 = scmp.ne.s32.totalorder %s27_s18, %s4547_s22  ;;  %p4553_p2 = scmp.lt.s32.totalorder %s4547_s22, %s4547_s22 }
  0x25   :  { %p4554_p3 = por %p4553_p2, %p4552_p1 }
  0x27   :  { %p4555_p4 = pnand %p4554_p3, %p4548_p0 }
  0x29   :  { %4558 = shalt.err (!%p4555_p4)
}
  0x2a   :  { %32 = dma.hbm_to_vmem [thread:$0]  %s6321_s1, 2048, %s27_s18, [#allocation4], %s4613_s27, %s4613_s27, %s4614_s28  }
  0x2b   :  { %s4616_s24 = smov [#allocation10]   ;;  %s4559_s30 = scalar_lea.hbm %s6323_s3, 6144 }
  0x2c   :  { %s50_s25 = sshll.u32 %s4616_s24, 4  ;;  %p4560_p5 = scmp.ne.s32.totalorder %s6323_s3, %s4559_s30  ;;  %s51_s25 = int_to_ptr.vmem [resolvable:$true] %s50_s25 }
  0x2d   :  { %p4563_p6 = scmp.lt.u32.totalorder %s4559_s30, %s6323_s3 }
  0x2f   :  { %p4565_p7 = pnand %p4563_p6, %p4560_p5 }
  0x31   :  { %4568 = shalt.err (!%p4565_p7)
}
  0x32   :  { %s4569_s9 = scalar_lea.vmem %s51_s25, 6144  ;;  %p4574_p9 = scmp.lt.s32.totalorder %s51_s25, %s51_s25 }
  0x33   :  { %p4570_p8 = scmp.ne.s32.totalorder %s51_s25, %s4569_s9  ;;  %p4575_p10 = scmp.lt.s32.totalorder %s4569_s9, %s4569_s9 }
  0x35   :  { %p4576_p11 = por %p4575_p10, %p4574_p9 }
  0x37   :  { %p4577_p12 = pnand %p4576_p11, %p4570_p8 }
  0x39   :  { %4580 = shalt.err (!%p4577_p12)
}
  0x3a   :  { %s4617_s1 = smov 384   ;;  %s4618_s18 = smov 24  }
  0x3b   :  { %56 = dma.hbm_to_vmem [thread:$0]  %s6323_s3, 6144, %s51_s25, [#allocation9], %s4617_s1, %s4617_s1, %s4618_s18  }
  0x3c   :  { %4603 = dma.done.wait [#allocation6], 16  }
  0x3d   :  { %4604 = vsyncadd [#allocation6], 4294967280 }
  0x3e   :  { %4605 = dma.done.wait [#allocation4], 2048  }
  0x3f   :  { %4606 = vsyncadd [#allocation4], 4294965248 }
  0x40   :  { %4607 = dma.done.wait [#allocation9], 8192  }
  0x41   :  { %4608 = vsyncadd [#allocation9], 4294959104 }
  0x42   :  { %69 = sfence }
  0x43   :  { %s74_s10 = sld [smem:[#allocation3]]  ;;  %s3294_s11 = sld [smem:[#allocation3 + $0x1]]  ;;  %v75_v0 = vld [vmem:[#allocation7] sm:$0xff]  ;;  %v77_v2 = vld [vmem:[#allocation7 + $0x10] sm:$0xff]  ;;  %v76_v4 = vld [vmem:[#allocation7 + $0x8] sm:$0xff] }
  0x44   :  { %v109_v1 = vld [vmem:[#allocation8] sm:$0xff]  ;;  %v111_v3 = vld [vmem:[#allocation8 + $0x10] sm:$0xff]  ;;  %v110_v5 = vld [vmem:[#allocation8 + $0x8] sm:$0xff]  ;;  %s4620_s3 = smov [#allocation11]  }
  0x45   :  { %v78_v6 = vld [vmem:[#allocation7 + $0x18] sm:$0xff]  ;;  %v79_v10 = vld [vmem:[#allocation7 + $0x20] sm:$0xff]  ;;  %v80_v16 = vld [vmem:[#allocation7 + $0x28] sm:$0xff]  ;;  %s3280_s12 = sshll.u32 %s4620_s3, 4  ;;  %s3281_s12 = int_to_ptr.vmem [resolvable:$true] %s3280_s12 }
  0x46   :  { %v112_v7 = vld [vmem:[#allocation8 + $0x18] sm:$0xff]  ;;  %v113_v11 = vld [vmem:[#allocation8 + $0x20] sm:$0xff]  ;;  %v114_v17 = vld [vmem:[#allocation8 + $0x28] sm:$0xff]  ;;  %s4581_s13 = scalar_lea.vmem %s3281_s12, 6144  ;;  %p4586_p0 = scmp.lt.s32.totalorder %s3281_s12, %s3281_s12 }
  0x47   :  { %v81_v22 = vld [vmem:[#allocation7 + $0x30] sm:$0xff]  ;;  %v82_v32 = vld [vmem:[#allocation7 + $0x38] sm:$0xff]  ;;  %v83_v38 = vld [vmem:[#allocation7 + $0x40] sm:$0xff]  ;;  %p4582_p13 = scmp.ne.s32.totalorder %s3281_s12, %s4581_s13  ;;  %p4587_p1 = scmp.lt.s32.totalorder %s4581_s13, %s4581_s13 }
  0x48   :  { %v115_v27 = vld [vmem:[#allocation8 + $0x30] sm:$0xff]  ;;  %v116_v33 = vld [vmem:[#allocation8 + $0x38] sm:$0xff]  ;;  %v117_v39 = vld [vmem:[#allocation8 + $0x40] sm:$0xff] }
  0x49   :  { %v4697_v8 = vstv %s74_s10  ;;  %v4699_v9 = vstv %s3294_s11  ;;  %v4728_v40 = vld [vmem:[#allocation10 + $0x8] sm:$0xff]  ;;  %v85_v47 = vld [vmem:[#allocation7 + $0x50] sm:$0xff]  ;;  %v86_v52 = vld [vmem:[#allocation7 + $0x58] sm:$0xff]  ;;  %p4588_p2 = por %p4587_p1, %p4586_p0 }
  0x4a   :  { %v92_v12 = vmul.f32 %v4697_v8, %v75_v0  ;;  %v126_v13 = vmul.f32 %v4699_v9, %v109_v1  ;;  %v94_v14 = vmul.f32 %v4697_v8, %v77_v2  ;;  %v128_v15 = vmul.f32 %v4699_v9, %v111_v3  ;;  %v84_v45 = vld [vmem:[#allocation7 + $0x48] sm:$0xff]  ;;  %v119_v51 = vld [vmem:[#allocation8 + $0x50] sm:$0xff]  ;;  %v120_v58 = vld [vmem:[#allocation8 + $0x58] sm:$0xff] }
  0x4b   :  { %v93_v18 = vmul.f32 %v4697_v8, %v76_v4  ;;  %v127_v19 = vmul.f32 %v4699_v9, %v110_v5  ;;  %v95_v20 = vmul.f32 %v4697_v8, %v78_v6  ;;  %v129_v21 = vmul.f32 %v4699_v9, %v112_v7  ;;  %v118_v46 = vld [vmem:[#allocation8 + $0x48] sm:$0xff]  ;;  %v4748_v59 = vld [vmem:[#allocation10 + $0x20] sm:$0xff]  ;;  %p4589_p3 = pnand %p4588_p2, %p4582_p13 }
  0x4c   :  { %v4709_v23 = vadd.f32 %v126_v13, %v92_v12  ;;  %v4711_v24 = vadd.f32 %v128_v15, %v94_v14  ;;  %v96_v25 = vmul.f32 %v4697_v8, %v79_v10  ;;  %v130_v26 = vmul.f32 %v4699_v9, %v113_v11  ;;  %v87_v0 = vld [vmem:[#allocation7 + $0x60] sm:$0xff]  ;;  %v88_v6 = vld [vmem:[#allocation7 + $0x68] sm:$0xff]  ;;  %v89_v13 = vld [vmem:[#allocation7 + $0x70] sm:$0xff] }
  0x4d   :  { %v4715_v28 = vadd.f32 %v127_v19, %v93_v18  ;;  %v4717_v29 = vadd.f32 %v129_v21, %v95_v20  ;;  %v97_v30 = vmul.f32 %v4697_v8, %v80_v16  ;;  %v131_v31 = vmul.f32 %v4699_v9, %v114_v17  ;;  %v121_v1 = vld [vmem:[#allocation8 + $0x60] sm:$0xff]  ;;  %v122_v7 = vld [vmem:[#allocation8 + $0x68] sm:$0xff]  ;;  %v123_v14 = vld [vmem:[#allocation8 + $0x70] sm:$0xff] }
  0x4e   :  { %v158_v34 = vmul.f32 %v4709_v23, %v4709_v23  ;;  %v160_v35 = vmul.f32 %v4711_v24, %v4711_v24  ;;  %v4725_v36 = vadd.f32 %v130_v26, %v96_v25  ;;  %v98_v37 = vmul.f32 %v4697_v8, %v81_v22  ;;  %v90_v20 = vld [vmem:[#allocation7 + $0x78] sm:$0xff]  ;;  %v4773_v21 = vld [vmem:[#allocation10] sm:$0xff] }
  0x4f   :  { %v159_v41 = vmul.f32 %v4715_v28, %v4715_v28  ;;  %v161_v42 = vmul.f32 %v4717_v29, %v4717_v29  ;;  %v4734_v43 = vadd.f32 %v131_v31, %v97_v30  ;;  %v132_v44 = vmul.f32 %v4699_v9, %v115_v27  ;;  %v124_v30 = vld [vmem:[#allocation8 + $0x78] sm:$0xff] }
  0x50   :  { %174 = vadd.xlane.f32.xlu0 %v158_v34  ;;  %178 = vadd.xlane.f32.xlu1 %v160_v35  ;;  %v162_v48 = vmul.f32 %v4725_v36, %v4725_v36  ;;  %v99_v49 = vmul.f32 %v4697_v8, %v82_v32  ;;  %v133_v50 = vmul.f32 %v4699_v9, %v116_v33  ;;  %v351_v53 = vand.u32 4294901760, %v4728_v40  ;;  %v306_v35 = vld [vmem:[#allocation10 + $0x18] sm:$0xff] }
  0x51   :  { %v163_v54 = vmul.f32 %v4734_v43, %v4734_v43  ;;  %v4744_v55 = vadd.f32 %v132_v44, %v98_v37  ;;  %v100_v56 = vmul.f32 %v4697_v8, %v83_v38  ;;  %v134_v57 = vmul.f32 %v4699_v9, %v117_v39 }
  0x52   :  { %v4750_v60 = vadd.f32 %v133_v50, %v99_v49  ;;  %v101_v61 = vmul.f32 %v4697_v8, %v84_v45  ;;  %v135_v62 = vmul.f32 %v4699_v9, %v118_v46  ;;  %v102_v63 = vmul.f32 %v4697_v8, %v85_v47 }
  0x53   :  { %v164_v2 = vmul.f32 %v4744_v55, %v4744_v55  ;;  %v4757_v3 = vadd.f32 %v134_v57, %v100_v56  ;;  %v136_v4 = vmul.f32 %v4699_v9, %v119_v51  ;;  %v103_v5 = vmul.f32 %v4697_v8, %v86_v52 }
  0x54   :  { %6515 = vst [vmem:[#allocation16_spill] sm:$0xff] %v4750_v60  ;;  %176 = vadd.xlane.f32.xlu0 %v159_v41  ;;  %180 = vadd.xlane.f32.xlu1 %v161_v42  ;;  %v165_v10 = vmul.f32 %v4750_v60, %v4750_v60  ;;  %v4763_v11 = vadd.f32 %v135_v62, %v101_v61  ;;  %v355_v15 = vand.u32 4294901760, %v4748_v59  ;;  %v353_v41 = vand.u32 4294901760, %v4773_v21  ;;  %v4795_v42 = vld [vmem:[#allocation10 + $0x38] sm:$0xff] }
  0x55   :  { %6516 = vst [vmem:[#allocation17_spill] sm:$0xff] %v4757_v3  ;;  %v137_v12 = vmul.f32 %v4699_v9, %v120_v58  ;;  %v166_v16 = vmul.f32 %v4757_v3, %v4757_v3  ;;  %v4769_v17 = vadd.f32 %v136_v4, %v102_v63  ;;  %v104_v18 = vmul.f32 %v4697_v8, %v87_v0  ;;  %v312_v0 = vld [vmem:[#allocation10 + $0x48] sm:$0xff] }
  0x56   :  { %6517 = vst [vmem:[#allocation18_spill] sm:$0xff] %v4763_v11  ;;  %v138_v19 = vmul.f32 %v4699_v9, %v121_v1  ;;  %v167_v22 = vmul.f32 %v4763_v11, %v4763_v11  ;;  %v105_v26 = vmul.f32 %v4697_v8, %v88_v6  ;;  %v139_v27 = vmul.f32 %v4699_v9, %v122_v7 }
  0x57   :  { %6518 = vst [vmem:[#allocation19_spill] sm:$0xff] %v4769_v17  ;;  %v4777_v25 = vadd.f32 %v137_v12, %v103_v5  ;;  %v4783_v31 = vmul.f32 %v4769_v17, %v4769_v17  ;;  %v106_v33 = vmul.f32 %v4697_v8, %v89_v13  ;;  %v140_v34 = vmul.f32 %v4699_v9, %v123_v14 }
  0x58   :  { %v4785_v32 = vadd.f32 %v138_v19, %v104_v18  ;;  %182 = vadd.xlane.f32.xlu0 %v162_v48  ;;  %184 = vadd.xlane.f32.xlu1 %v163_v54  ;;  %v4791_v38 = vadd.f32 %v139_v27, %v105_v26  ;;  %v107_v39 = vmul.f32 %v4697_v8, %v90_v20  ;;  %v4809_v48 = vld [vmem:[#allocation10 + $0x50] sm:$0xff]  ;;  %v357_v50 = vand.u32 4294901760, %v306_v35 }
  0x59   :  { %6519 = vst [vmem:[#allocation20_spill] sm:$0xff] %v4777_v25  ;;  %v169_v37 = vmul.f32 %v4777_v25, %v4777_v25  ;;  %v4801_v45 = vadd.f32 %v140_v34, %v106_v33  ;;  %v141_v46 = vmul.f32 %v4699_v9, %v124_v30  ;;  %v4807_v47 = vsub.f32 %v4728_v40, %v351_v53  ;;  %v4823_v9 = vld [vmem:[#allocation10 + $0x30] sm:$0xff]  ;;  %v4867_v30 = vld [vmem:[#allocation10 + $0x68] sm:$0xff] }
  0x5a   :  { %6520 = vst [vmem:[#allocation21_spill] sm:$0xff] %v4785_v32  ;;  %6521 = vst [vmem:[#allocation22_spill] sm:$0xff] %v4791_v38  ;;  %v4799_v44 = vmul.f32 %v4785_v32, %v4785_v32  ;;  %v4813_v8 = vmul.f32 %v4791_v38, %v4791_v38  ;;  %v4818_v49 = vsub.f32 %v4748_v59, %v355_v15  ;;  %v359_v57 = vand.u32 4294901760, %v4795_v42  ;;  %v5076_v25 = vld [vmem:[#allocation10 + $0x128] sm:$0xff] }
  0x5b   :  { %6522 = vst [vmem:[#allocation23_spill] sm:$0xff] %v4801_v45  ;;  %6523 = vst [vmem:[#allocation24_spill] sm:$0xff] %v4807_v47  ;;  %v4821_v51 = vsub.f32 %v4773_v21, %v353_v41  ;;  %v4827_v52 = vmul.f32 %v4801_v45, %v4801_v45  ;;  %v4829_v54 = vadd.f32 %v141_v46, %v107_v39  ;;  %v6336_v56 = vand.u32 4294901760, %v4807_v47  ;;  %v4883_v39 = vld [vmem:[#allocation10 + $0x60] sm:$0xff] }
  0x5c   :  { %6524 = vst [vmem:[#allocation25_spill] sm:$0xff] %v4818_v49  ;;  %186 = vadd.xlane.f32.xlu0 %v164_v2  ;;  %188 = vadd.xlane.f32.xlu1 %v165_v10  ;;  %v6334_v58 = vand.u32 4294901760, %v4818_v49  ;;  %v4835_v62 = vsub.f32 %v306_v35, %v357_v50  ;;  %v363_v63 = vand.u32 4294901760, %v4809_v48  ;;  %v4846_v2 = vsub.f32 %v4795_v42, %v359_v57 }
  0x5d   :  { %6525 = vst [vmem:[#allocation26_spill] sm:$0xff] %v4829_v54  ;;  %v6333_v61 = vand.u32 4294901760, %v4821_v51  ;;  %v4840_v1 = vmul.f32 %v4829_v54, %v4829_v54  ;;  %v627_v4 = vsub.f32 %v4807_v47, %v6336_v56  ;;  %v361_v5 = vand.u32 4294901760, %v4823_v9 }
  0x5e   :  { %v639_v6 = vsub.f32 %v4818_v49, %v6334_v58  ;;  %v6332_v10 = vand.u32 4294901760, %v4835_v62  ;;  %v4857_v12 = vsub.f32 %v4809_v48, %v363_v63  ;;  %v6330_v14 = vand.u32 4294901760, %v4846_v2 }
  0x5f   :  { %v633_v7 = vsub.f32 %v4821_v51, %v6333_v61  ;;  %v628_v13 = vand.u32 4294901760, %v627_v4  ;;  %v365_v18 = vand.u32 4294901760, %v312_v0  ;;  %v4861_v19 = vsub.f32 %v4823_v9, %v361_v5  ;;  %v4976_v61 = vld [vmem:[#allocation10 + $0xc8] sm:$0xff] }
  0x60   :  { %190 = vadd.xlane.f32.xlu0 %v166_v16  ;;  %192 = vadd.xlane.f32.xlu1 %v167_v22  ;;  %v640_v20 = vand.u32 4294901760, %v639_v6  ;;  %v645_v26 = vsub.f32 %v4835_v62, %v6332_v10  ;;  %v6327_v27 = vand.u32 4294901760, %v4857_v12  ;;  %v651_v33 = vsub.f32 %v4846_v2, %v6330_v14  ;;  %v4881_v22 = vld [vmem:[#allocation10 + $0x80] sm:$0xff] }
  0x61   :  { %v634_v21 = vand.u32 4294901760, %v633_v7  ;;  %v6326_v34 = vand.u32 4294901760, %v4861_v19  ;;  %v4873_v35 = vsub.f32 %v312_v0, %v365_v18  ;;  %v4879_v16 = vpack.c.bf16 %v355_v15, %v351_v53  ;;  %v4892_v0 = vld [vmem:[#allocation10 + $0x78] sm:$0xff] }
  0x62   :  { %v4885_v42 = vpack.c.bf16 %v640_v20, %v628_v13  ;;  %v646_v46 = vand.u32 4294901760, %v645_v26  ;;  %v663_v48 = vsub.f32 %v4857_v12, %v6327_v27  ;;  %v4890_v9 = vpack.c.bf16 %v357_v50, %v353_v41 }
  0x63   :  { %6526 = vst [vmem:[#allocation27_spill] sm:$0xff] %v4879_v16  ;;  %v652_v40 = vand.u32 4294901760, %v651_v33  ;;  %v657_v53 = vsub.f32 %v4861_v19, %v6326_v34  ;;  %v6325_v59 = vand.u32 4294901760, %v4873_v35  ;;  %3824 = vmatprep.subr.bf16.mxu1 %v4879_v16  ;;  %v367_v15 = vand.u32 4294901760, %v4867_v30 }
  0x64   :  { %6527 = vst [vmem:[#allocation28_spill] sm:$0xff] %v4890_v9  ;;  %194 = vadd.xlane.f32.xlu0 %v4783_v31  ;;  %196 = vadd.xlane.f32.xlu1 %v169_v37  ;;  %v4901_v4 = vpack.c.bf16 %v646_v46, %v634_v21  ;;  %v664_v41 = vand.u32 4294901760, %v663_v48  ;;  %v371_v50 = vand.u32 4294901760, %v4881_v22  ;;  %v369_v6 = vand.u32 4294901760, %v4883_v39  ;;  %v4914_v37 = vld [vmem:[#allocation10 + $0x98] sm:$0xff]  ;;  %v4916_v21 = vld [vmem:[#allocation10 + $0xb0] sm:$0xff] }
  0x65   :  { %3856 = vmatprep.subr.bf16.mxu0 %v4885_v42  ;;  %v658_v7 = vand.u32 4294901760, %v657_v53  ;;  %v669_v13 = vsub.f32 %v4873_v35, %v6325_v59  ;;  %3826 = vmatpush1.bf16.msra.mxu1 %v4890_v9  ;;  %v4911_v20 = vsub.f32 %v4867_v30, %v367_v15  ;;  %v373_v31 = vand.u32 4294901760, %v4892_v0  ;;  %v4929_v30 = vld [vmem:[#allocation10 + $0x90] sm:$0xff] }
  0x66   :  { %3858 = vmatpush1.bf16.msra.mxu0 %v4901_v4  ;;  %v4919_v26 = vpack.c.bf16 %v664_v41, %v652_v40  ;;  %v4922_v33 = vsub.f32 %v4881_v22, %v371_v50  ;;  %v4925_v46 = vsub.f32 %v4883_v39, %v369_v6  ;;  %v4927_v48 = vpack.c.bf16 %v363_v63, %v359_v57  ;;  %v324_v40 = vld [vmem:[#allocation10 + $0xa8] sm:$0xff] }
  0x67   :  { %v670_v53 = vand.u32 4294901760, %v669_v13  ;;  %v6328_v59 = vand.u32 4294901760, %v4911_v20  ;;  %v4933_v34 = vsub.f32 %v4892_v0, %v373_v31  ;;  %v4935_v27 = vpack.c.bf16 %v365_v18, %v361_v5 }
  0x68   :  { %6528 = vst [vmem:[#allocation29_spill] sm:$0xff] %v4919_v26  ;;  %6529 = vst [vmem:[#allocation30_spill] sm:$0xff] %v4922_v33  ;;  %198 = vadd.xlane.f32.xlu0 %v4799_v44  ;;  %200 = vadd.xlane.f32.xlu1 %v4813_v8  ;;  %v6329_v22 = vand.u32 4294901760, %v4922_v33  ;;  %v6331_v39 = vand.u32 4294901760, %v4925_v46  ;;  %v375_v57 = vand.u32 4294901760, %v4914_v37  ;;  %v379_v63 = vand.u32 4294901760, %v4916_v21 }
  0x69   :  { %6530 = vst [vmem:[#allocation31_spill] sm:$0xff] %v4925_v46  ;;  %6531 = vst [vmem:[#allocation32_spill] sm:$0xff] %v4927_v48  ;;  %3860 = vmatprep.subr.bf16.mxu0 %v4919_v26  ;;  %v4944_v41 = vpack.c.bf16 %v670_v53, %v658_v7  ;;  %v675_v5 = vsub.f32 %v4911_v20, %v6328_v59  ;;  %v6335_v44 = vand.u32 4294901760, %v4933_v34  ;;  %3828 = vmatprep.subr.bf16.mxu1 %v4927_v48 }
  0x6a   :  { %6532 = vst [vmem:[#allocation33_spill] sm:$0xff] %v4933_v34  ;;  %6533 = vst [vmem:[#allocation34_spill] sm:$0xff] %v4935_v27  ;;  %v377_v8 = vand.u32 4294901760, %v4929_v30  ;;  %v687_v18 = vsub.f32 %v4922_v33, %v6329_v22  ;;  %v681_v0 = vsub.f32 %v4925_v46, %v6331_v39  ;;  %3830 = vmatpush1.bf16.msra.mxu1 %v4935_v27  ;;  %v381_v22 = vand.u32 4294901760, %v324_v40 }
  0x6b   :  { %6534 = vst [vmem:[#allocation35_spill] sm:$0xff] %v4944_v41  ;;  %v4960_v7 = vsub.f32 %v4914_v37, %v375_v57  ;;  %v4963_v13 = vsub.f32 %v4916_v21, %v379_v63  ;;  %3862 = vmatpush1.bf16.msra.mxu0 %v4944_v41  ;;  %v676_v53 = vand.u32 4294901760, %v675_v5  ;;  %v693_v59 = vsub.f32 %v4933_v34, %v6335_v44 }
  0x6c   :  { %v4970_v14 = vsub.f32 %v4929_v30, %v377_v8  ;;  %202 = vadd.xlane.f32.xlu0 %v4827_v52  ;;  %204 = vadd.xlane.f32.xlu1 %v4840_v1  ;;  %v688_v37 = vand.u32 4294901760, %v687_v18  ;;  %v682_v39 = vand.u32 4294901760, %v681_v0  ;;  %v4979_v44 = vsub.f32 %v324_v40, %v381_v22  ;;  %v4983_v30 = vld [vmem:[#allocation10 + $0xe0] sm:$0xff]  ;;  %v4997_v40 = vld [vmem:[#allocation10 + $0xd8] sm:$0xff] }
  0x6d   :  { %v6337_v21 = vand.u32 4294901760, %v4960_v7  ;;  %v6338_v10 = vand.u32 4294901760, %v4963_v13  ;;  %v694_v5 = vand.u32 4294901760, %v693_v59  ;;  %v4981_v56 = vpack.c.bf16 %v371_v50, %v367_v15  ;;  %v4985_v52 = vld [vmem:[#allocation10 + $0xc0] sm:$0xff] }
  0x6e   :  { %6535 = vst [vmem:[#allocation36_spill] sm:$0xff] %v4970_v14  ;;  %v6339_v58 = vand.u32 4294901760, %v4970_v14  ;;  %6536 = vst [vmem:[#allocation37_spill] sm:$0xff] %v4979_v44  ;;  %v4987_v1 = vpack.c.bf16 %v688_v37, %v676_v53  ;;  %v4995_v0 = vpack.c.bf16 %v373_v31, %v369_v6  ;;  %v6346_v53 = vand.u32 4294901760, %v4979_v44 }
  0x6f   :  { %6537 = vst [vmem:[#allocation38_spill] sm:$0xff] %v4981_v56  ;;  %v699_v18 = vsub.f32 %v4960_v7, %v6337_v21  ;;  %v711_v59 = vsub.f32 %v4963_v13, %v6338_v10  ;;  %v4999_v15 = vpack.c.bf16 %v694_v5, %v682_v39  ;;  %3832 = vmatprep.subr.bf16.mxu1 %v4981_v56  ;;  %v383_v37 = vand.u32 4294901760, %v4976_v61 }
  0x70   :  { %6538 = vst [vmem:[#allocation39_spill] sm:$0xff] %v4987_v1  ;;  %6539 = vst [vmem:[#allocation40_spill] sm:$0xff] %v4995_v0  ;;  %v705_v50 = vsub.f32 %v4970_v14, %v6339_v58  ;;  %3864 = vmatprep.subr.bf16.mxu0 %v4987_v1  ;;  %3834 = vmatpush1.bf16.msra.mxu1 %v4995_v0  ;;  %v387_v6 = vand.u32 4294901760, %v4983_v30  ;;  %v385_v31 = vand.u32 4294901760, %v4985_v52  ;;  %v389_v54 = vand.u32 4294901760, %v4997_v40 }
  0x71   :  { %6540 = vst [vmem:[#allocation41_spill] sm:$0xff] %v4999_v15  ;;  %v700_v21 = vand.u32 4294901760, %v699_v18  ;;  %v712_v10 = vand.u32 4294901760, %v711_v59  ;;  %3866 = vmatpush1.bf16.msra.mxu0 %v4999_v15  ;;  %v717_v5 = vsub.f32 %v4979_v44, %v6346_v53  ;;  %v5016_v58 = vsub.f32 %v4976_v61, %v383_v37  ;;  %v5019_v18 = vld [vmem:[#allocation10 + $0xf8] sm:$0xff]  ;;  %v5021_v59 = vld [vmem:[#allocation10 + $0x110] sm:$0xff] }
  0x72   :  { %v706_v39 = vand.u32 4294901760, %v705_v50  ;;  %v5026_v45 = vsub.f32 %v4983_v30, %v387_v6  ;;  %v5029_v50 = vsub.f32 %v4985_v52, %v385_v31  ;;  %v5031_v56 = vpack.c.bf16 %v379_v63, %v375_v57  ;;  %v5033_v53 = vld [vmem:[#allocation10 + $0xf0] sm:$0xff]  ;;  %v336_v30 = vld [vmem:[#allocation10 + $0x108] sm:$0xff] }
  0x73   :  { %6541 = vst [vmem:[#allocation42_spill] sm:$0xff] %v5016_v58  ;;  %v5023_v0 = vpack.c.bf16 %v712_v10, %v700_v21  ;;  %v718_v61 = vand.u32 4294901760, %v717_v5  ;;  %v6354_v27 = vand.u32 4294901760, %v5016_v58  ;;  %v5037_v38 = vsub.f32 %v4997_v40, %v389_v54 }
  0x74   :  { %6543 = vst [vmem:[#allocation44_spill] sm:$0xff] %v5026_v45  ;;  %6544 = vst [vmem:[#allocation45_spill] sm:$0xff] %v5029_v50  ;;  %v5039_v48 = vpack.c.bf16 %v381_v22, %v377_v8  ;;  %v6359_v10 = vand.u32 4294901760, %v5026_v45  ;;  %v6363_v21 = vand.u32 4294901760, %v5029_v50  ;;  %3836 = vmatprep.subr.bf16.mxu1 %v5031_v56  ;;  %v391_v57 = vand.u32 4294901760, %v5019_v18 }
  0x75   :  { %6542 = vst [vmem:[#allocation43_spill] sm:$0xff] %v5023_v0  ;;  %6545 = vst [vmem:[#allocation46_spill] sm:$0xff] %v5031_v56  ;;  %3868 = vmatprep.subr.bf16.mxu0 %v5023_v0  ;;  %v395_v63 = vand.u32 4294901760, %v5021_v59  ;;  %v5047_v52 = vpack.c.bf16 %v718_v61, %v706_v39  ;;  %v723_v22 = vsub.f32 %v5016_v58, %v6354_v27  ;;  %v6367_v8 = vand.u32 4294901760, %v5037_v38  ;;  %v5085_v0 = vld [vmem:[#allocation10 + $0x120] sm:$0xff] }
  0x76   :  { %6546 = vst [vmem:[#allocation47_spill] sm:$0xff] %v5037_v38  ;;  %6547 = vst [vmem:[#allocation48_spill] sm:$0xff] %v5039_v48  ;;  %3838 = vmatpush1.bf16.msra.mxu1 %v5039_v48  ;;  %v393_v40 = vand.u32 4294901760, %v5033_v53  ;;  %v735_v5 = vsub.f32 %v5026_v45, %v6359_v10  ;;  %v729_v56 = vsub.f32 %v5029_v50, %v6363_v21  ;;  %v397_v9 = vand.u32 4294901760, %v336_v30 }
  0x77   :  { %6548 = vst [vmem:[#allocation49_spill] sm:$0xff] %v5047_v52  ;;  %v5062_v39 = vsub.f32 %v5019_v18, %v391_v57  ;;  %v5065_v61 = vsub.f32 %v5021_v59, %v395_v63  ;;  %3870 = vmatpush1.bf16.msra.mxu0 %v5047_v52  ;;  %v724_v27 = vand.u32 4294901760, %v723_v22  ;;  %v741_v48 = vsub.f32 %v5037_v38, %v6367_v8  ;;  %v5083_v8 = vld [vmem:[#allocation10 + $0x140] sm:$0xff] }
  0x78   :  { %v5072_v10 = vsub.f32 %v5033_v53, %v393_v40  ;;  %v736_v32 = vand.u32 4294901760, %v735_v5  ;;  %v730_v16 = vand.u32 4294901760, %v729_v56  ;;  %v5079_v22 = vsub.f32 %v336_v30, %v397_v9  ;;  %v5097_v30 = vld [vmem:[#allocation10 + $0x138] sm:$0xff] }
  0x79   :  { %6549 = vst [vmem:[#allocation50_spill] sm:$0xff] %v5062_v39  ;;  %6550 = vst [vmem:[#allocation51_spill] sm:$0xff] %v5065_v61  ;;  %v6369_v21 = vand.u32 4294901760, %v5062_v39  ;;  %v6370_v18 = vand.u32 4294901760, %v5065_v61  ;;  %v742_v59 = vand.u32 4294901760, %v741_v48  ;;  %v5081_v17 = vpack.c.bf16 %v387_v6, %v383_v37 }
  0x7a   :  { %6551 = vst [vmem:[#allocation52_spill] sm:$0xff] %v5072_v10  ;;  %v6371_v52 = vand.u32 4294901760, %v5072_v10  ;;  %6552 = vst [vmem:[#allocation53_spill] sm:$0xff] %v5079_v22  ;;  %v5087_v53 = vpack.c.bf16 %v736_v32, %v724_v27  ;;  %v5095_v5 = vpack.c.bf16 %v389_v54, %v385_v31  ;;  %v6380_v32 = vand.u32 4294901760, %v5079_v22 }
  0x7b   :  { %6553 = vst [vmem:[#allocation54_spill] sm:$0xff] %v5081_v17  ;;  %v747_v56 = vsub.f32 %v5062_v39, %v6369_v21  ;;  %v759_v48 = vsub.f32 %v5065_v61, %v6370_v18  ;;  %v5099_v37 = vpack.c.bf16 %v742_v59, %v730_v16  ;;  %3840 = vmatprep.subr.bf16.mxu1 %v5081_v17  ;;  %v399_v27 = vand.u32 4294901760, %v5076_v25 }
  0x7c   :  { %6554 = vst [vmem:[#allocation55_spill] sm:$0xff] %v5087_v53  ;;  %6555 = vst [vmem:[#allocation56_spill] sm:$0xff] %v5095_v5  ;;  %v753_v6 = vsub.f32 %v5072_v10, %v6371_v52  ;;  %3872 = vmatprep.subr.bf16.mxu0 %v5087_v53  ;;  %3842 = vmatpush1.bf16.msra.mxu1 %v5095_v5  ;;  %v403_v54 = vand.u32 4294901760, %v5083_v8  ;;  %v401_v16 = vand.u32 4294901760, %v5085_v0  ;;  %v405_v17 = vand.u32 4294901760, %v5097_v30 }
  0x7d   :  { %6556 = vst [vmem:[#allocation57_spill] sm:$0xff] %v5099_v37  ;;  %v748_v21 = vand.u32 4294901760, %v747_v56  ;;  %v760_v18 = vand.u32 4294901760, %v759_v48  ;;  %3874 = vmatpush1.bf16.msra.mxu0 %v5099_v37  ;;  %v765_v59 = vsub.f32 %v5079_v22, %v6380_v32  ;;  %v5116_v52 = vsub.f32 %v5076_v25, %v399_v27  ;;  %v346_v56 = vld [vmem:[#allocation10 + $0x158] sm:$0xff]  ;;  %v349_v48 = vld [vmem:[#allocation10 + $0x170] sm:$0xff] }
  0x7e   :  { %v754_v31 = vand.u32 4294901760, %v753_v6  ;;  %v5122_v5 = vsub.f32 %v5083_v8, %v403_v54  ;;  %v5125_v11 = vsub.f32 %v5085_v0, %v401_v16  ;;  %v5127_v6 = vpack.c.bf16 %v395_v63, %v391_v57  ;;  %v345_v37 = vld [vmem:[#allocation10 + $0x150] sm:$0xff]  ;;  %v348_v63 = vld [vmem:[#allocation10 + $0x168] sm:$0xff] }
  0x7f   :  { %6557 = vst [vmem:[#allocation58_spill] sm:$0xff] %v5116_v52  ;;  %v5119_v53 = vpack.c.bf16 %v760_v18, %v748_v21  ;;  %v766_v15 = vand.u32 4294901760, %v765_v59  ;;  %v6385_v32 = vand.u32 4294901760, %v5116_v52  ;;  %v5131_v25 = vsub.f32 %v5097_v30, %v405_v17 }
  0x80   :  { %6559 = vst [vmem:[#allocation60_spill] sm:$0xff] %v5122_v5  ;;  %6560 = vst [vmem:[#allocation61_spill] sm:$0xff] %v5125_v11  ;;  %v5133_v3 = vpack.c.bf16 %v397_v9, %v393_v40  ;;  %v6390_v21 = vand.u32 4294901760, %v5122_v5  ;;  %v6392_v8 = vand.u32 4294901760, %v5125_v11  ;;  %3844 = vmatprep.subr.bf16.mxu1 %v5127_v6  ;;  %v407_v0 = vand.u32 4294901760, %v346_v56 }
  0x81   :  { %6558 = vst [vmem:[#allocation59_spill] sm:$0xff] %v5119_v53  ;;  %6561 = vst [vmem:[#allocation62_spill] sm:$0xff] %v5127_v6  ;;  %3876 = vmatprep.subr.bf16.mxu0 %v5119_v53  ;;  %v411_v57 = vand.u32 4294901760, %v349_v48  ;;  %v5139_v18 = vpack.c.bf16 %v766_v15, %v754_v31  ;;  %v771_v30 = vsub.f32 %v5116_v52, %v6385_v32  ;;  %v6398_v9 = vand.u32 4294901760, %v5131_v25 }
  0x82   :  { %6562 = vst [vmem:[#allocation63_spill] sm:$0xff] %v5131_v25  ;;  %6563 = vst [vmem:[#allocation64_spill] sm:$0xff] %v5133_v3  ;;  %3846 = vmatpush1.bf16.msra.mxu1 %v5133_v3  ;;  %v409_v40 = vand.u32 4294901760, %v345_v37  ;;  %v783_v59 = vsub.f32 %v5122_v5, %v6390_v21  ;;  %v777_v6 = vsub.f32 %v5125_v11, %v6392_v8  ;;  %v413_v3 = vand.u32 4294901760, %v348_v63 }
  0x83   :  { %6564 = vst [vmem:[#allocation65_spill] sm:$0xff] %v5139_v18  ;;  %v5152_v53 = vsub.f32 %v346_v56, %v407_v0  ;;  %v5154_v15 = vsub.f32 %v349_v48, %v411_v57  ;;  %3878 = vmatpush1.bf16.msra.mxu0 %v5139_v18  ;;  %v772_v31 = vand.u32 4294901760, %v771_v30  ;;  %v789_v32 = vsub.f32 %v5131_v25, %v6398_v9 }
  0x84   :  { %v5160_v1 = vsub.f32 %v345_v37, %v409_v40  ;;  %v784_v41 = vand.u32 4294901760, %v783_v59  ;;  %v778_v21 = vand.u32 4294901760, %v777_v6  ;;  %v5165_v26 = vsub.f32 %v348_v63, %v413_v3 }
  0x85   :  { %6565 = vst [vmem:[#allocation66_spill] sm:$0xff] %v5152_v53  ;;  %6566 = vst [vmem:[#allocation67_spill] sm:$0xff] %v5154_v15  ;;  %v6397_v60 = vand.u32 4294901760, %v5152_v53  ;;  %v6396_v8 = vand.u32 4294901760, %v5154_v15  ;;  %v790_v56 = vand.u32 4294901760, %v789_v32  ;;  %v5167_v18 = vpack.c.bf16 %v403_v54, %v399_v27 }
  0x86   :  { %6567 = vst [vmem:[#allocation68_spill] sm:$0xff] %v5160_v1  ;;  %v6395_v48 = vand.u32 4294901760, %v5160_v1  ;;  %6568 = vst [vmem:[#allocation69_spill] sm:$0xff] %v5165_v26  ;;  %v5169_v30 = vpack.c.bf16 %v784_v41, %v772_v31  ;;  %v6399_v63 = vand.u32 4294901760, %v5165_v26  ;;  %v6400_v41 = vmov 0.0  }
  0x87   :  { %6569 = vst [vmem:[#allocation70_spill] sm:$0xff] %v5167_v18  ;;  %v795_v37 = vsub.f32 %v5152_v53, %v6397_v60  ;;  %v807_v6 = vsub.f32 %v5154_v15, %v6396_v8  ;;  %v5177_v59 = vpack.c.bf16 %v790_v56, %v778_v21  ;;  %3848 = vmatprep.subr.bf16.mxu1 %v5167_v18 }
  0x88   :  { %v801_v32 = vsub.f32 %v5160_v1, %v6395_v48  ;;  %848 = vmatprep.mubr.f32.mxu0 %v6400_v41  ;;  %v5185_v27 = vpack.c.bf16 %v405_v17, %v401_v16  ;;  %3880 = vmatprep.subr.bf16.mxu0 %v5169_v30  ;;  %v3887_v21 = vpack.c.bf16 %v4818_v49, %v4807_v47 }
  0x89   :  { %v796_v54 = vand.u32 4294901760, %v795_v37  ;;  %v808_v31 = vand.u32 4294901760, %v807_v6  ;;  %447 = vmatprep.mubr.f32.mxu1 %v6400_v41  ;;  %3882 = vmatpush1.bf16.msra.mxu0 %v5177_v59  ;;  %v813_v17 = vsub.f32 %v5165_v26, %v6399_v63  ;;  %v5198_v16 = vpack.c.bf16 %v411_v57, %v407_v0 }
  0x8a   :  { %6570 = vst [vmem:[#allocation71_spill] sm:$0xff] %v5185_v27  ;;  %v802_v48 = vand.u32 4294901760, %v801_v32  ;;  %3850 = vmatpush1.bf16.msra.mxu1 %v5185_v27  ;;  %v5200_v37 = vpack.c.bf16 %v413_v3, %v409_v40 }
  0x8b   :  { %6571 = vst [vmem:[#allocation72_spill] sm:$0xff] %v5198_v16  ;;  %v5202_v6 = vpack.c.bf16 %v808_v31, %v796_v54  ;;  %v814_v9 = vand.u32 4294901760, %v813_v17  ;;  %3852 = vmatprep.subr.bf16.mxu1 %v5198_v16 }
  0x8c   :  { %6572 = vst [vmem:[#allocation73_spill] sm:$0xff] %v5200_v37 }
  0x8d   :  { %3884 = vmatprep.subr.bf16.mxu0 %v5202_v6  ;;  %v5226_v63 = vpack.c.bf16 %v814_v9, %v802_v48 }
  0x8e   :  { %3854 = vmatpush1.bf16.msra.mxu1 %v5200_v37 }
  0x8f   :  { %4207 = vmatprep.subr.bf16.mxu1 %v4885_v42  ;;  %3886 = vmatpush1.bf16.msra.mxu0 %v5226_v63 }
  0x90   :  { %3888 = vmatprep.subr.bf16.mxu0 %v3887_v21 }
  0xdd   :  { %v175_v9 = vpop.xlane.xlu0 %174  ;;  %v179_v48 = vpop.xlane.xlu1 %178 }
  0xde   :  { %v207_v17 = vmul.f32 0.0078125, %v175_v9  ;;  %v209_v54 = vmul.f32 0.0078125, %v179_v48 }
  0xe0   :  { %v223_v0 = vadd.f32 1.1920929e-07, %v207_v17  ;;  %v225_v57 = vadd.f32 1.1920929e-07, %v209_v54 }
  0xe1   :  { %v177_v32 = vpop.xlane.xlu0 %176  ;;  %v181_v60 = vpop.xlane.xlu1 %180 }
  0xe2   :  { %4473 = vrsqrt.f32 %v223_v0  ;;  %v208_v3 = vmul.f32 0.0078125, %v177_v32  ;;  %v210_v8 = vmul.f32 0.0078125, %v181_v60 }
  0xe3   :  { %4475 = vrsqrt.f32 %v225_v57 }
  0xe4   :  { %v224_v40 = vadd.f32 1.1920929e-07, %v208_v3  ;;  %v226_v42 = vadd.f32 1.1920929e-07, %v210_v8 }
  0xe5   :  { %v183_v41 = vpop.xlane.xlu0 %182  ;;  %v185_v56 = vpop.xlane.xlu1 %184 }
  0xe6   :  { %4477 = vrsqrt.f32 %v224_v40  ;;  %v211_v31 = vmul.f32 0.0078125, %v183_v41  ;;  %v212_v37 = vmul.f32 0.0078125, %v185_v56 }
  0xe7   :  { %4479 = vrsqrt.f32 %v226_v42 }
  0xe8   :  { %v227_v21 = vadd.f32 1.1920929e-07, %v211_v31  ;;  %v228_v49 = vadd.f32 1.1920929e-07, %v212_v37 }
  0xe9   :  { %v187_v9 = vpop.xlane.xlu0 %186  ;;  %v189_v48 = vpop.xlane.xlu1 %188 }
  0xea   :  { %4481 = vrsqrt.f32 %v227_v21  ;;  %v213_v54 = vmul.f32 0.0078125, %v187_v9  ;;  %v214_v17 = vmul.f32 0.0078125, %v189_v48  ;;  %v6577_v48 = vmov 0.0  }
  0xeb   :  { %4483 = vrsqrt.f32 %v228_v49 }
  0xec   :  { %v4474_v0 = vpop.eup %4473  ;;  %v229_v32 = vadd.f32 1.1920929e-07, %v213_v54  ;;  %v230_v8 = vadd.f32 1.1920929e-07, %v214_v17 }
  0xed   :  { %v4476_v60 = vpop.eup %4475  ;;  %v255_v3 = vmul.f32 %v4474_v0, %v4709_v23  ;;  %v191_v57 = vpop.xlane.xlu0 %190  ;;  %v6580_v0 = vpack.c.bf16 %v4857_v12, %v4846_v2 }
  0xee   :  { %v193_v47 = vpop.xlane.xlu1 %192  ;;  %v257_v41 = vmul.f32 %v4476_v60, %v4711_v24  ;;  %4485 = vrsqrt.f32 %v229_v32  ;;  %v215_v56 = vmul.f32 0.0078125, %v191_v57  ;;  %v6576_v24 = vpack.c.bf16 %v4835_v62, %v4821_v51 }
  0xef   :  { %v5241_v40 = vand.u32 4294901760, %v255_v3  ;;  %v216_v42 = vmul.f32 0.0078125, %v193_v47  ;;  %4487 = vrsqrt.f32 %v230_v8 }
  0xf0   :  { %v4478_v37 = vpop.eup %4477  ;;  %v5243_v31 = vand.u32 4294901760, %v257_v41  ;;  %v231_v54 = vadd.f32 1.1920929e-07, %v215_v56 }
  0xf1   :  { %6573 = vst [vmem:[#allocation74_spill] sm:$0xff] %v5241_v40  ;;  %v4480_v21 = vpop.eup %4479  ;;  %v256_v49 = vmul.f32 %v4478_v37, %v4715_v28  ;;  %850 = vmatmul.mubr.f32.vlgmr.msra.gmra.mrb[0].mxu0 %v5241_v40  ;;  %v5248_v23 = vsub.f32 %v255_v3, %v5241_v40  ;;  %v195_v17 = vpop.xlane.xlu0 %194  ;;  %v232_v3 = vadd.f32 1.1920929e-07, %v216_v42 }
  0xf2   :  { %6574 = vst [vmem:[#allocation75_spill] sm:$0xff] %v5243_v31  ;;  %v258_v9 = vmul.f32 %v4480_v21, %v4717_v29  ;;  %3890 = vmatpush1.bf16.msra.mxu0 %v6576_v24  ;;  %855 = vmatprep.mubr.f32.mxu0 %v6577_v48  ;;  %v5256_v47 = vsub.f32 %v257_v41, %v5243_v31  ;;  %v217_v37 = vmul.f32 0.0078125, %v195_v17  ;;  %4489 = vrsqrt.f32 %v231_v54  ;;  %v197_v42 = vpop.xlane.xlu1 %196 }
  0xf3   :  { %6575 = vst [vmem:[#allocation76_spill] sm:$0xff] %v5248_v23  ;;  %v5258_v28 = vand.u32 4294901760, %v256_v49  ;;  %3892 = vmatprep.subr.bf16.mxu0 %v6580_v0  ;;  %v5264_v32 = vand.u32 4294901760, %v5248_v23  ;;  %v6583_v24 = vpack.c.bf16 %v4873_v35, %v4861_v19  ;;  %4491 = vrsqrt.f32 %v232_v3 }
  0xf4   :  { %6578 = vst [vmem:[#allocation77_spill] sm:$0xff] %v5256_v47  ;;  %v4482_v29 = vpop.eup %4481  ;;  %v5266_v60 = vand.u32 4294901760, %v258_v9 }
  0xf5   :  { %6579 = vst [vmem:[#allocation78_spill] sm:$0xff] %v5258_v28  ;;  %v4484_v8 = vpop.eup %4483  ;;  %v259_v57 = vmul.f32 %v4482_v29, %v4725_v36  ;;  %857 = vmatmul.mubr.f32.gmra.mrb[2].mxu0 %v5258_v28  ;;  %v451_v41 = vsub.f32 %v5248_v23, %v5264_v32  ;;  %v5273_v56 = vsub.f32 %v256_v49, %v5258_v28  ;;  %v5281_v36 = vand.u32 4294901760, %v5256_v47 }
  0xf6   :  { %6581 = vst [vmem:[#allocation79_spill] sm:$0xff] %v5266_v60  ;;  %v260_v21 = vmul.f32 %v4484_v8, %v4734_v43  ;;  %3894 = vmatpush1.bf16.msra.mxu0 %v6583_v24  ;;  %862 = vmatprep.mubr.f32.mxu0 %v6577_v48  ;;  %v6585_v49 = vpack.c.bf16 %v4922_v33, %v4911_v20  ;;  %v218_v24 = vmul.f32 0.0078125, %v197_v42  ;;  %v199_v42 = vpop.xlane.xlu0 %198  ;;  %v201_v33 = vpop.xlane.xlu1 %200 }
  0xf7   :  { %6582 = vst [vmem:[#allocation80_spill] sm:$0xff] %v5273_v56  ;;  %v5283_v0 = vand.u32 4294901760, %v259_v57  ;;  %v5285_v29 = vand.u32 4294901760, %v451_v41  ;;  %v5291_v43 = vand.u32 4294901760, %v5273_v56  ;;  %v5294_v17 = vsub.f32 %v258_v9, %v5266_v60 }
  0xf8   :  { %3896 = vmatprep.subr.bf16.mxu0 %v6585_v49  ;;  %v4486_v8 = vpop.eup %4485  ;;  %v233_v41 = vadd.f32 1.1920929e-07, %v217_v37  ;;  %v5300_v28 = vand.u32 4294901760, %v260_v21  ;;  %v6589_v49 = vpack.c.bf16 %v4933_v34, %v4925_v46  ;;  %v473_v9 = vsub.f32 %v5256_v47, %v5281_v36  ;;  %v6592_v34 = vld [vmem:[#allocation29_spill] sm:$0xff] }
  0xf9   :  { %6584 = vst [vmem:[#allocation81_spill] sm:$0xff] %v5283_v0  ;;  %6586 = vst [vmem:[#allocation82_spill] sm:$0xff] %v5291_v43  ;;  %453 = vmatmul.mubr.f32.vlgmr.msra.gmra.mrb[0].mxu1 %v5285_v29  ;;  %864 = vmatmul.mubr.f32.gmra.mrb[4].mxu0 %v5243_v31  ;;  %v462_v54 = vsub.f32 %v5273_v56, %v5291_v43  ;;  %v4488_v40 = vpop.eup %4487  ;;  %v261_v31 = vmul.f32 %v4486_v8, %v4744_v55  ;;  %v5314_v37 = vand.u32 4294901760, %v5294_v17  ;;  %v6593_v8 = vld [vmem:[#allocation16_spill] sm:$0xff] }
  0xfa   :  { %6587 = vst [vmem:[#allocation83_spill] sm:$0xff] %v5294_v17  ;;  %6588 = vst [vmem:[#allocation84_spill] sm:$0xff] %v5300_v28  ;;  %4215 = vmatpush1.bf16.msra.mxu1 %v4901_v4  ;;  %3898 = vmatpush1.bf16.msra.mxu0 %v6589_v49  ;;  %v5317_v4 = vsub.f32 %v259_v57, %v5283_v0  ;;  %v6591_v49 = vpack.c.bf16 %v4963_v13, %v4960_v7  ;;  %4493 = vrsqrt.f32 %v233_v41  ;;  %v6597_v41 = vld [vmem:[#allocation35_spill] sm:$0xff] }
  0xfb   :  { %458 = vmatprep.mubr.f32.mxu1 %v6577_v48  ;;  %869 = vmatprep.mubr.f32.mxu0 %v6577_v48  ;;  %v5311_v3 = vand.u32 4294901760, %v462_v54  ;;  %v234_v55 = vadd.f32 1.1920929e-07, %v218_v24  ;;  %v262_v54 = vmul.f32 %v4488_v40, %v6593_v8  ;;  %v6594_v46 = vpack.c.bf16 %v4979_v44, %v4970_v14 }
  0xfc   :  { %6590 = vst [vmem:[#allocation85_spill] sm:$0xff] %v5317_v4  ;;  %3900 = vmatprep.subr.bf16.mxu0 %v6591_v49  ;;  %4208 = vmatprep.subr.bf16.mxu1 %v6592_v34  ;;  %v219_v57 = vmul.f32 0.0078125, %v199_v42  ;;  %v5331_v49 = vsub.f32 %v260_v21, %v5300_v28  ;;  %v5333_v34 = vand.u32 4294901760, %v261_v31  ;;  %v484_v40 = vsub.f32 %v5294_v17, %v5314_v37  ;;  %v4490_v24 = vpop.eup %4489  ;;  %v6599_v21 = vld [vmem:[#allocation39_spill] sm:$0xff] }
  0xfd   :  { %464 = vmatmul.mubr.f32.gmra.mrb[2].mxu1 %v5311_v3  ;;  %871 = vmatmul.mubr.f32.gmra.mrb[6].mxu0 %v5266_v60  ;;  %v5336_v60 = vand.u32 4294901760, %v473_v9  ;;  %v6598_v42 = vpack.c.bf16 %v5026_v45, %v5016_v58  ;;  %4495 = vrsqrt.f32 %v234_v55  ;;  %v220_v9 = vmul.f32 0.0078125, %v201_v33 }
  0xfe   :  { %3902 = vmatpush1.bf16.msra.mxu0 %v6594_v46  ;;  %469 = vmatprep.mubr.f32.mxu1 %v6577_v48  ;;  %6595 = vst [vmem:[#allocation29_spill] sm:$0xff] %v5331_v49  ;;  %6596 = vst [vmem:[#allocation16_spill] sm:$0xff] %v5333_v34  ;;  %v5342_v46 = vand.u32 4294901760, %v5317_v4  ;;  %v5350_v8 = vand.u32 4294901760, %v262_v54  ;;  %v235_v44 = vadd.f32 1.1920929e-07, %v219_v57  ;;  %v5357_v45 = vand.u32 4294901760, %v5331_v49  ;;  %v203_v57 = vpop.xlane.xlu0 %202 }
  0xff   :  { %876 = vmatprep.mubr.f32.mxu0 %v6577_v48  ;;  %4216 = vmatpush1.bf16.msra.mxu1 %v6597_v41  ;;  %v6601_v41 = vpack.c.bf16 %v5037_v38, %v5029_v50  ;;  %v6603_v33 = vpack.c.bf16 %v5065_v61, %v5062_v39  ;;  %v6605_v38 = vld [vmem:[#allocation41_spill] sm:$0xff]  ;;  %v6607_v61 = vpack.c.bf16 %v5079_v22, %v5072_v10  ;;  %v6637_v10 = vld [vmem:[#allocation34_spill] sm:$0xff] }
 0x100   :  { %3904 = vmatprep.subr.bf16.mxu0 %v6598_v42  ;;  %4209 = vmatprep.subr.bf16.mxu1 %v6599_v21  ;;  %6600 = vst [vmem:[#allocation35_spill] sm:$0xff] %v5350_v8  ;;  %v4492_v42 = vpop.eup %4491  ;;  %v6602_v21 = vld [vmem:[#allocation17_spill] sm:$0xff]  ;;  %v495_v55 = vsub.f32 %v5317_v4, %v5342_v46  ;;  %4497 = vrsqrt.f32 %v235_v44  ;;  %v5393_v44 = vsub.f32 %v262_v54, %v5350_v8 }
 0x101   :  { %475 = vmatmul.mubr.f32.gmra.mrb[4].mxu1 %v5336_v60  ;;  %878 = vmatmul.mubr.f32.gmra.mrb[8].mxu0 %v5283_v0  ;;  %v263_v58 = vmul.f32 %v4490_v24, %v6602_v21  ;;  %v5361_v0 = vand.u32 4294901760, %v484_v40  ;;  %v236_v24 = vadd.f32 1.1920929e-07, %v220_v9  ;;  %v6606_v40 = vld [vmem:[#allocation18_spill] sm:$0xff]  ;;  %v6609_v9 = vpack.c.bf16 %v5122_v5, %v5116_v52 }
 0x102   :  { %3906 = vmatpush1.bf16.msra.mxu0 %v6601_v41  ;;  %480 = vmatprep.mubr.f32.mxu1 %v6577_v48  ;;  %v5369_v41 = vsub.f32 %v261_v31, %v5333_v34  ;;  %v264_v21 = vmul.f32 %v4492_v42, %v6606_v40  ;;  %v506_v31 = vsub.f32 %v5331_v49, %v5357_v45  ;;  %v205_v42 = vpop.xlane.xlu1 %204  ;;  %v6612_v40 = vld [vmem:[#allocation43_spill] sm:$0xff] }
 0x103   :  { %883 = vmatprep.mubr.f32.mxu0 %v6577_v48  ;;  %3908 = vmatprep.subr.bf16.mxu0 %v6603_v33  ;;  %v221_v33 = vmul.f32 0.0078125, %v203_v57  ;;  %6611 = vst [vmem:[#allocation18_spill] sm:$0xff] %v5393_v44  ;;  %4499 = vrsqrt.f32 %v236_v24  ;;  %v6614_v57 = vld [vmem:[#allocation19_spill] sm:$0xff]  ;;  %v222_v54 = vmul.f32 0.0078125, %v205_v42  ;;  %v6616_v24 = vpack.c.bf16 %v5154_v15, %v5152_v53  ;;  %v6621_v42 = vld [vmem:[#allocation20_spill] sm:$0xff] }
 0x104   :  { %6604 = vst [vmem:[#allocation39_spill] sm:$0xff] %v5369_v41  ;;  %4217 = vmatpush1.bf16.msra.mxu1 %v6605_v38  ;;  %v4494_v39 = vpop.eup %4493  ;;  %v5381_v38 = vand.u32 4294901760, %v263_v58 }
 0x105   :  { %486 = vmatmul.mubr.f32.gmra.mrb[6].mxu1 %v5361_v0  ;;  %885 = vmatmul.mubr.f32.gmra.mrb[10].mxu0 %v5300_v28  ;;  %v5384_v28 = vand.u32 4294901760, %v495_v55  ;;  %v5398_v55 = vand.u32 4294901760, %v264_v21  ;;  %v265_v22 = vmul.f32 %v4494_v39, %v6614_v57  ;;  %v237_v5 = vadd.f32 1.1920929e-07, %v221_v33  ;;  %v6619_v33 = vld [vmem:[#allocation49_spill] sm:$0xff] }
 0x106   :  { %3910 = vmatpush1.bf16.msra.mxu0 %v6607_v61  ;;  %491 = vmatprep.mubr.f32.mxu1 %v6577_v48  ;;  %6608 = vst [vmem:[#allocation17_spill] sm:$0xff] %v5381_v38  ;;  %v5390_v61 = vand.u32 4294901760, %v5369_v41  ;;  %v5414_v57 = vand.u32 4294901760, %v5393_v44  ;;  %v238_v53 = vadd.f32 1.1920929e-07, %v222_v54 }
 0x107   :  { %890 = vmatprep.mubr.f32.mxu0 %v6577_v48  ;;  %3912 = vmatprep.subr.bf16.mxu0 %v6609_v9  ;;  %6613 = vst [vmem:[#allocation43_spill] sm:$0xff] %v5398_v55  ;;  %v6615_v9 = vpack.c.bf16 %v5131_v25, %v5125_v11  ;;  %v4496_v52 = vpop.eup %4495  ;;  %4501 = vrsqrt.f32 %v237_v5  ;;  %v6632_v11 = vld [vmem:[#allocation32_spill] sm:$0xff] }
 0x108   :  { %6610 = vst [vmem:[#allocation41_spill] sm:$0xff] %v5390_v61  ;;  %4210 = vmatprep.subr.bf16.mxu1 %v6612_v40  ;;  %v5406_v40 = vand.u32 4294901760, %v506_v31  ;;  %v517_v39 = vsub.f32 %v5369_v41, %v5390_v61  ;;  %6617 = vst [vmem:[#allocation19_spill] sm:$0xff] %v5414_v57  ;;  %v5422_v31 = vand.u32 4294901760, %v265_v22  ;;  %v266_v15 = vmul.f32 %v4496_v52, %v6621_v42  ;;  %v6642_v61 = vld [vmem:[#allocation40_spill] sm:$0xff] }
 0x109   :  { %497 = vmatmul.mubr.f32.gmra.mrb[8].mxu1 %v5384_v28  ;;  %892 = vmatmul.mubr.f32.gmra.mrb[12].mxu0 %v5333_v34  ;;  %v5439_v52 = vsub.f32 %v264_v21, %v5398_v55  ;;  %4503 = vrsqrt.f32 %v238_v53  ;;  %v6628_v21 = vld [vmem:[#allocation21_spill] sm:$0xff]  ;;  %v6633_v53 = vld [vmem:[#allocation59_spill] sm:$0xff] }
 0x10a   :  { %3914 = vmatpush1.bf16.msra.mxu0 %v6615_v9  ;;  %502 = vmatprep.mubr.f32.mxu1 %v6577_v48  ;;  %v5417_v9 = vsub.f32 %v263_v58, %v5381_v38  ;;  %6620 = vst [vmem:[#allocation49_spill] sm:$0xff] %v5422_v31  ;;  %v5430_v58 = vand.u32 4294901760, %v517_v39  ;;  %v4498_v42 = vpop.eup %4497  ;;  %v5444_v5 = vand.u32 4294901760, %v266_v15  ;;  %v5449_v54 = vsub.f32 %v265_v22, %v5422_v31  ;;  %v5465_v22 = vld [vmem:[#allocation10 + $0x10] sm:$0xff] }
 0x10b   :  { %897 = vmatprep.mubr.f32.mxu0 %v6577_v48  ;;  %3916 = vmatprep.subr.bf16.mxu0 %v6616_v24  ;;  %v6622_v24 = vpack.c.bf16 %v5165_v26, %v5160_v1  ;;  %6625 = vst [vmem:[#allocation87_spill] sm:$0xff] %v5439_v52  ;;  %v6630_v1 = vld [vmem:[#allocation57_spill] sm:$0xff]  ;;  %v5459_v25 = vand.u32 4294901760, %v5439_v52 }
 0x10c   :  { %6618 = vst [vmem:[#allocation86_spill] sm:$0xff] %v5417_v9  ;;  %4218 = vmatpush1.bf16.msra.mxu1 %v6619_v33  ;;  %v528_v33 = vsub.f32 %v5393_v44, %v5414_v57  ;;  %v5436_v34 = vand.u32 4294901760, %v5417_v9  ;;  %v6639_v57 = vld [vmem:[#allocation38_spill] sm:$0xff] }
 0x10d   :  { %508 = vmatmul.mubr.f32.gmra.mrb[10].mxu1 %v5406_v40  ;;  %899 = vmatmul.mubr.f32.gmra.mrb[14].mxu0 %v5350_v8  ;;  %v6623_v8 = vld [vmem:[#allocation27_spill] sm:$0xff]  ;;  %v4500_v39 = vpop.eup %4499  ;;  %6631 = vst [vmem:[#allocation21_spill] sm:$0xff] %v5459_v25 }
 0x10e   :  { %3918 = vmatpush1.bf16.msra.mxu0 %v6622_v24  ;;  %513 = vmatprep.mubr.f32.mxu1 %v6577_v48  ;;  %6624 = vst [vmem:[#allocation20_spill] sm:$0xff] %v5436_v34  ;;  %v6626_v24 = vld [vmem:[#allocation55_spill] sm:$0xff]  ;;  %v5452_v26 = vand.u32 4294901760, %v528_v33  ;;  %v5467_v33 = vld [vmem:[#allocation10 + $0x28] sm:$0xff] }
 0x10f   :  { %1089 = vmatprep.mubr.f32.mxu0 %v6577_v48  ;;  %3920 = vmatprep.subr.bf16.mxu0 %v6623_v8  ;;  %6627 = vst [vmem:[#allocation55_spill] sm:$0xff] %v5449_v54  ;;  %v267_v8 = vmul.f32 %v4498_v42, %v6628_v21  ;;  %v5475_v42 = vsub.f32 %v266_v15, %v5444_v5 }
 0x110   :  { %4211 = vmatprep.subr.bf16.mxu1 %v6626_v24  ;;  %v6629_v24 = vld [vmem:[#allocation28_spill] sm:$0xff] }
 0x111   :  { %519 = vmatmul.mubr.f32.gmra.mrb[12].mxu1 %v5430_v58  ;;  %1092 = vmatmul.mubr.f32.vlgmr.msra.gmra.mrb[0].mxu0 %v5248_v23  ;;  %v539_v23 = vsub.f32 %v5417_v9, %v5436_v34  ;;  %6635 = vst [vmem:[#allocation59_spill] sm:$0xff] %v5475_v42  ;;  %v5477_v21 = vand.u32 4294901760, %v267_v8  ;;  %v6638_v34 = vld [vmem:[#allocation65_spill] sm:$0xff]  ;;  %v4502_v50 = vpop.eup %4501 }
 0x112   :  { %524 = vmatprep.mubr.f32.mxu1 %v6577_v48  ;;  %1097 = vmatprep.mubr.f32.mxu0 %v6577_v48 }
 0x113   :  { %3922 = vmatpush1.bf16.msra.mxu0 %v6629_v24  ;;  %4219 = vmatpush1.bf16.msra.mxu1 %v6630_v1  ;;  %v5472_v1 = vand.u32 4294901760, %v5449_v54  ;;  %v5480_v24 = vand.u32 4294901760, %v539_v23 }
 0x114   :  { %3924 = vmatprep.subr.bf16.mxu0 %v6632_v11  ;;  %4212 = vmatprep.subr.bf16.mxu1 %v6633_v53  ;;  %v6636_v53 = vld [vmem:[#allocation22_spill] sm:$0xff] }
 0x115   :  { %530 = vmatmul.mubr.f32.gmra.mrb[14].mxu1 %v5452_v26  ;;  %1100 = vmatmul.mubr.f32.gmra.mrb[2].mxu0 %v5273_v56  ;;  %6634 = vst [vmem:[#allocation57_spill] sm:$0xff] %v5472_v1  ;;  %v268_v11 = vmul.f32 %v4500_v39, %v6636_v53  ;;  %v550_v56 = vsub.f32 %v5439_v52, %v5459_v25  ;;  %v6646_v25 = vand.u32 4294901760, %v5467_v33 }
 0x116   :  { %535 = vmatprep.mubr.f32.mxu1 %v6577_v48  ;;  %1105 = vmatprep.mubr.f32.mxu0 %v6577_v48  ;;  %v561_v23 = vsub.f32 %v5449_v54, %v5472_v1  ;;  %v6645_v1 = vand.u32 4294901760, %v5465_v22 }
 0x117   :  { %3926 = vmatpush1.bf16.msra.mxu0 %v6637_v10  ;;  %4220 = vmatpush1.bf16.msra.mxu1 %v6638_v34  ;;  %v5497_v34 = vand.u32 4294901760, %v5475_v42  ;;  %v5499_v39 = vand.u32 4294901760, %v268_v11  ;;  %v5502_v15 = vand.u32 4294901760, %v550_v56  ;;  %v4504_v10 = vpop.eup %4503  ;;  %v6648_v56 = vld [vmem:[#allocation26_spill] sm:$0xff] }
 0x118   :  { %3928 = vmatprep.subr.bf16.mxu0 %v6639_v57  ;;  %4213 = vmatprep.subr.bf16.mxu1 %v5169_v30  ;;  %v6641_v30 = vld [vmem:[#allocation23_spill] sm:$0xff]  ;;  %v5506_v57 = vsub.f32 %v267_v8, %v5477_v21  ;;  %v5515_v14 = vpack.c.bf16 %v6646_v25, %v6645_v1  ;;  %v270_v8 = vmul.f32 %v4504_v10, %v6648_v56 }
 0x119   :  { %541 = vmatmul.mubr.f32.gmra.mrb[16].mxu1 %v5480_v24  ;;  %1108 = vmatmul.mubr.f32.gmra.mrb[4].mxu0 %v5256_v47  ;;  %6640 = vst [vmem:[#allocation22_spill] sm:$0xff] %v5497_v34  ;;  %v269_v53 = vmul.f32 %v4502_v50, %v6641_v30  ;;  %v6644_v47 = vld [vmem:[#allocation46_spill] sm:$0xff]  ;;  %v5521_v50 = vand.u32 4294901760, %v561_v23  ;;  %v5532_v1 = vsub.f32 %v268_v11, %v5499_v39  ;;  %v6651_v30 = vld [vmem:[#allocation48_spill] sm:$0xff] }
 0x11a   :  { %546 = vmatprep.mubr.f32.mxu1 %v6577_v48  ;;  %1113 = vmatprep.mubr.f32.mxu0 %v6577_v48  ;;  %6643 = vst [vmem:[#allocation65_spill] sm:$0xff] %v5506_v57  ;;  %6647 = vst [vmem:[#allocation23_spill] sm:$0xff] %v5515_v14  ;;  %v5529_v25 = vand.u32 4294901760, %v5506_v57  ;;  %v5544_v11 = vand.u32 4294901760, %v270_v8 }
 0x11b   :  { %3930 = vmatpush1.bf16.msra.mxu0 %v6642_v61  ;;  %4221 = vmatpush1.bf16.msra.mxu1 %v5177_v59  ;;  %v572_v59 = vsub.f32 %v5475_v42, %v5497_v34  ;;  %6650 = vst [vmem:[#allocation88_spill] sm:$0xff] %v5532_v1  ;;  %v5654_v34 = vld [vmem:[#allocation10 + $0x100] sm:$0xff] }
 0x11c   :  { %3932 = vmatprep.subr.bf16.mxu0 %v6644_v47  ;;  %4214 = vmatprep.subr.bf16.mxu1 %v5202_v6  ;;  %v5525_v6 = vand.u32 4294901760, %v269_v53  ;;  %6649 = vst [vmem:[#allocation26_spill] sm:$0xff] %v5529_v25  ;;  %v6652_v47 = vld [vmem:[#allocation54_spill] sm:$0xff]  ;;  %v583_v23 = vsub.f32 %v5506_v57, %v5529_v25 }
 0x11d   :  { %552 = vmatmul.mubr.f32.gmra.mrb[18].mxu1 %v5502_v15  ;;  %1116 = vmatmul.mubr.f32.gmra.mrb[6].mxu0 %v5294_v17  ;;  %v5542_v10 = vand.u32 4294901760, %v572_v59  ;;  %v5640_v25 = vld [vmem:[#allocation10 + $0xd0] sm:$0xff] }
 0x11e   :  { %557 = vmatprep.mubr.f32.mxu1 %v6577_v48  ;;  %1121 = vmatprep.mubr.f32.mxu0 %v6577_v48  ;;  %v5552_v56 = vsub.f32 %v269_v53, %v5525_v6  ;;  %v5560_v59 = vand.u32 4294901760, %v583_v23 }
 0x11f   :  { %3934 = vmatpush1.bf16.msra.mxu0 %v6651_v30  ;;  %4222 = vmatpush1.bf16.msra.mxu1 %v5226_v63  ;;  %v5549_v63 = vand.u32 4294901760, %v5532_v1  ;;  %v6656_v30 = vld [vmem:[#allocation62_spill] sm:$0xff] }
 0x120   :  { %3936 = vmatprep.subr.bf16.mxu0 %v6652_v47  ;;  %4016 = vmatprep.subr.bf16.mxu1 %v5515_v14  ;;  %6654 = vst [vmem:[#allocation90_spill] sm:$0xff] %v5552_v56  ;;  %v6655_v47 = vld [vmem:[#allocation56_spill] sm:$0xff]  ;;  %v5565_v53 = vand.u32 4294901760, %v5552_v56 }
 0x121   :  { %563 = vmatmul.mubr.f32.gmra.mrb[20].mxu1 %v5521_v50  ;;  %1124 = vmatmul.mubr.f32.gmra.mrb[8].mxu0 %v5317_v4  ;;  %6653 = vst [vmem:[#allocation89_spill] sm:$0xff] %v5549_v63  ;;  %v594_v61 = vsub.f32 %v5532_v1, %v5549_v63  ;;  %v6664_v4 = vld [vmem:[#allocation25_spill] sm:$0xff] }
 0x122   :  { %568 = vmatprep.mubr.f32.mxu1 %v6577_v48  ;;  %1129 = vmatprep.mubr.f32.mxu0 %v6577_v48  ;;  %6657 = vst [vmem:[#allocation91_spill] sm:$0xff] %v5565_v53 }
 0x123   :  { %3938 = vmatpush1.bf16.msra.mxu0 %v6655_v47  ;;  %v5568_v47 = vsub.f32 %v270_v8, %v5544_v11  ;;  %v5576_v23 = vand.u32 4294901760, %v594_v61 }
 0x124   :  { %3940 = vmatprep.subr.bf16.mxu0 %v6656_v30  ;;  %v6659_v30 = vld [vmem:[#allocation64_spill] sm:$0xff] }
 0x125   :  { %574 = vmatmul.mubr.f32.gmra.mrb[22].mxu1 %v5542_v10  ;;  %1132 = vmatmul.mubr.f32.gmra.mrb[10].mxu0 %v5331_v49  ;;  %6658 = vst [vmem:[#allocation92_spill] sm:$0xff] %v5568_v47  ;;  %6660 = vst [vmem:[#allocation93_spill] sm:$0xff] %v5576_v23  ;;  %v605_v49 = vsub.f32 %v5552_v56, %v5565_v53  ;;  %v5581_v8 = vand.u32 4294901760, %v5568_v47  ;;  %v6667_v53 = vld [vmem:[#allocation73_spill] sm:$0xff] }
 0x126   :  { %579 = vmatprep.mubr.f32.mxu1 %v6577_v48  ;;  %1137 = vmatprep.mubr.f32.mxu0 %v6577_v48 }
 0x127   :  { %3942 = vmatpush1.bf16.msra.mxu0 %v6659_v30  ;;  %6661 = vst [vmem:[#allocation94_spill] sm:$0xff] %v5581_v8  ;;  %v5593_v61 = vand.u32 4294901760, %v605_v49 }
 0x128   :  { %3944 = vmatprep.subr.bf16.mxu0 %v5167_v18  ;;  %v6662_v18 = vld [vmem:[#allocation24_spill] sm:$0xff] }
 0x129   :  { %585 = vmatmul.mubr.f32.gmra.mrb[24].mxu1 %v5560_v59  ;;  %1140 = vmatmul.mubr.f32.gmra.mrb[12].mxu0 %v5369_v41  ;;  %v6663_v30 = vand.u32 4294901760, %v6662_v18  ;;  %v6665_v41 = vand.u32 4294901760, %v6664_v4  ;;  %6666 = vst [vmem:[#allocation24_spill] sm:$0xff] %v5593_v61  ;;  %v5600_v18 = vld [vmem:[#allocation10 + $0x58] sm:$0xff] }
 0x12a   :  { %590 = vmatprep.mubr.f32.mxu1 %v6577_v48  ;;  %1145 = vmatprep.mubr.f32.mxu0 %v6577_v48 }
 0x12b   :  { %3946 = vmatpush1.bf16.msra.mxu0 %v5185_v27  ;;  %v3951_v17 = vpack.c.bf16 %v6665_v41, %v6663_v30  ;;  %v616_v27 = vsub.f32 %v5568_v47, %v5581_v8  ;;  %v1951_v41 = vand.u32 4294901760, %v5600_v18  ;;  %v5610_v30 = vld [vmem:[#allocation10 + $0x70] sm:$0xff]  ;;  %v5624_v8 = vld [vmem:[#allocation10 + $0xb8] sm:$0xff] }
 0x12c   :  { %3948 = vmatprep.subr.bf16.mxu0 %v5198_v16  ;;  %v5598_v16 = vld [vmem:[#allocation10 + $0x40] sm:$0xff] }
 0x12d   :  { %596 = vmatmul.mubr.f32.gmra.mrb[26].mxu1 %v5576_v23  ;;  %1148 = vmatmul.mubr.f32.gmra.mrb[14].mxu0 %v5393_v44  ;;  %v5606_v4 = vand.u32 4294901760, %v616_v27  ;;  %v1948_v49 = vand.u32 4294901760, %v5598_v16  ;;  %v6478_v27 = vand.u32 4294901760, %v5610_v30  ;;  %v5622_v44 = vld [vmem:[#allocation10 + $0xa0] sm:$0xff]  ;;  %v6500_v23 = vand.u32 4294901760, %v5654_v34 }
 0x12e   :  { %601 = vmatprep.mubr.f32.mxu1 %v6577_v48  ;;  %1153 = vmatprep.mubr.f32.mxu0 %v6577_v48  ;;  %v1960_v63 = vand.u32 4294901760, %v5622_v44 }
 0x12f   :  { %3950 = vmatpush1.bf16.msra.mxu0 %v6667_v53  ;;  %6668 = vst [vmem:[#allocation25_spill] sm:$0xff] %v5606_v4  ;;  %v5612_v53 = vld [vmem:[#allocation10 + $0x88] sm:$0xff] }
 0x130   :  { %3952 = vmatprep.subr.bf16.mxu0 %v3951_v17  ;;  %v5618_v17 = vpack.c.bf16 %v1951_v41, %v1948_v49 }
 0x131   :  { %607 = vmatmul.mubr.f32.gmra.mrb[28].mxu1 %v5593_v61  ;;  %1156 = vmatmul.mubr.f32.gmra.mrb[16].mxu0 %v5417_v9  ;;  %v6477_v9 = vand.u32 4294901760, %v5612_v53 }
 0x132   :  { %612 = vmatprep.mubr.f32.mxu1 %v6577_v48  ;;  %1161 = vmatprep.mubr.f32.mxu0 %v6577_v48  ;;  %6669 = vst [vmem:[#allocation95_spill] sm:$0xff] %v5618_v17 }
 0x135   :  { %618 = vmatmul.mubr.f32.gmra.mrb[30].mxu1 %v5606_v4  ;;  %1164 = vmatmul.mubr.f32.gmra.mrb[18].mxu0 %v5439_v52  ;;  %v5636_v52 = vpack.c.bf16 %v6477_v9, %v6478_v27  ;;  %v5656_v4 = vld [vmem:[#allocation10 + $0x118] sm:$0xff]  ;;  %v6672_v27 = vand.u32 4294901760, %v5465_v22 }
 0x136   :  { %904 = vmatprep.mubr.f32.mxu1 %v6577_v48  ;;  %1169 = vmatprep.mubr.f32.mxu0 %v6577_v48 }
 0x137   :  { %6670 = vst [vmem:[#allocation96_spill] sm:$0xff] %v5636_v52 }
 0x139   :  { %906 = vmatmul.mubr.f32.vlgmr.msra.gmra.mrb[16].mxu1 %v5381_v38  ;;  %1172 = vmatmul.mubr.f32.gmra.mrb[20].mxu0 %v5449_v54  ;;  %v1963_v38 = vand.u32 4294901760, %v5624_v8  ;;  %v5642_v54 = vld [vmem:[#allocation10 + $0xe8] sm:$0xff] }
 0x13a   :  { %4018 = vmatpush3.bf16.msra.mxu1 %v5515_v14  ;;  %911 = vmatprep.mubr.f32.mxu1 %v6577_v48  ;;  %v5669_v14 = vsub.f32 %v5465_v22, %v6672_v27  ;;  %v6499_v22 = vand.u32 4294901760, %v5656_v4  ;;  %v5710_v27 = vsub.f32 %v5600_v18, %v1951_v41 }
 0x13b   :  { %1177 = vmatprep.mubr.f32.mxu0 %v6577_v48  ;;  %4020 = vmatprep.subr.bf16.mxu1 %v5618_v17  ;;  %v5650_v9 = vpack.c.bf16 %v1963_v38, %v1960_v63 }
 0x13c   :  { %v6680_v18 = vand.u32 4294901760, %v5669_v14 }
 0x13d   :  { %913 = vmatmul.mubr.f32.gmra.mrb[18].mxu1 %v5398_v55  ;;  %1180 = vmatmul.mubr.f32.gmra.mrb[22].mxu0 %v5475_v42  ;;  %6671 = vst [vmem:[#allocation97_spill] sm:$0xff] %v5650_v9  ;;  %v5662_v42 = vld [vmem:[#allocation10 + $0x130] sm:$0xff]  ;;  %v6673_v55 = vand.u32 4294901760, %v5467_v33 }
 0x13e   :  { %4022 = vmatpush3.bf16.msra.mxu1 %v5618_v17  ;;  %918 = vmatprep.mubr.f32.mxu1 %v6577_v48  ;;  %v5664_v17 = vld [vmem:[#allocation10 + $0x148] sm:$0xff]  ;;  %v2186_v41 = vsub.f32 %v5669_v14, %v6680_v18 }
 0x13f   :  { %1185 = vmatprep.mubr.f32.mxu0 %v6577_v48  ;;  %4024 = vmatprep.subr.bf16.mxu1 %v5636_v52  ;;  %v5674_v61 = vsub.f32 %v5467_v33, %v6673_v55  ;;  %v5702_v55 = vld [vmem:[#allocation10 + $0x160] sm:$0xff]  ;;  %v5704_v33 = vld [vmem:[#allocation10 + $0x178] sm:$0xff] }
 0x141   :  { %920 = vmatmul.mubr.f32.gmra.mrb[20].mxu1 %v5422_v31  ;;  %1188 = vmatmul.mubr.f32.gmra.mrb[24].mxu0 %v5506_v57  ;;  %v6674_v57 = vand.u32 4294901760, %v5640_v25 }
 0x142   :  { %4026 = vmatpush3.bf16.msra.mxu1 %v5636_v52  ;;  %925 = vmatprep.mubr.f32.mxu1 %v6577_v48  ;;  %v6675_v52 = vand.u32 4294901760, %v5642_v54 }
 0x143   :  { %1193 = vmatprep.mubr.f32.mxu0 %v6577_v48  ;;  %4028 = vmatprep.subr.bf16.mxu1 %v5650_v9 }
 0x144   :  { %v5682_v31 = vpack.c.bf16 %v6675_v52, %v6674_v57  ;;  %v5700_v52 = vpack.c.bf16 %v6499_v22, %v6500_v23  ;;  %v6678_v57 = vand.u32 4294901760, %v5662_v42  ;;  %v6681_v23 = vand.u32 4294901760, %v5674_v61 }
 0x145   :  { %927 = vmatmul.mubr.f32.gmra.mrb[22].mxu1 %v5444_v5  ;;  %1196 = vmatmul.mubr.f32.gmra.mrb[26].mxu0 %v5532_v1  ;;  %v5707_v1 = vsub.f32 %v5598_v16, %v1948_v49  ;;  %v6682_v16 = vand.u32 4294901760, %v5610_v30 }
 0x146   :  { %6676 = vst [vmem:[#allocation98_spill] sm:$0xff] %v5682_v31  ;;  %4030 = vmatpush3.bf16.msra.mxu1 %v5650_v9  ;;  %932 = vmatprep.mubr.f32.mxu1 %v6577_v48  ;;  %6677 = vst [vmem:[#allocation99_spill] sm:$0xff] %v5700_v52  ;;  %v6679_v9 = vand.u32 4294901760, %v5664_v17 }
 0x147   :  { %1201 = vmatprep.mubr.f32.mxu0 %v6577_v48  ;;  %4032 = vmatprep.subr.bf16.mxu1 %v5682_v31  ;;  %v5737_v49 = vsub.f32 %v5610_v30, %v6682_v16  ;;  %v6684_v30 = vand.u32 4294901760, %v5702_v55  ;;  %v6685_v16 = vand.u32 4294901760, %v5704_v33 }
 0x148   :  { %v5718_v22 = vpack.c.bf16 %v6679_v9, %v6678_v57  ;;  %v5750_v9 = vsub.f32 %v5624_v8, %v1963_v38 }
 0x149   :  { %934 = vmatmul.mubr.f32.gmra.mrb[24].mxu1 %v5477_v21  ;;  %1204 = vmatmul.mubr.f32.gmra.mrb[28].mxu0 %v5552_v56  ;;  %v2193_v56 = vsub.f32 %v5674_v61, %v6681_v23  ;;  %v5747_v23 = vsub.f32 %v5622_v44, %v1960_v63  ;;  %v6686_v44 = vand.u32 4294901760, %v5707_v1  ;;  %v6687_v63 = vand.u32 4294901760, %v5710_v27 }
 0x14a   :  { %4034 = vmatpush3.bf16.msra.mxu1 %v5682_v31  ;;  %939 = vmatprep.mubr.f32.mxu1 %v6577_v48  ;;  %v6683_v31 = vand.u32 4294901760, %v5612_v53 }
 0x14b   :  { %1209 = vmatprep.mubr.f32.mxu0 %v6577_v48  ;;  %4036 = vmatprep.subr.bf16.mxu1 %v5700_v52  ;;  %v2194_v57 = vand.u32 4294901760, %v2193_v56  ;;  %v2200_v38 = vsub.f32 %v5707_v1, %v6686_v44  ;;  %v2207_v8 = vsub.f32 %v5710_v27, %v6687_v63  ;;  %v6689_v56 = vand.u32 4294901760, %v4835_v62 }
 0x14c   :  { %v5742_v18 = vsub.f32 %v5612_v53, %v6683_v31  ;;  %v5758_v31 = vpack.c.bf16 %v6685_v16, %v6684_v30  ;;  %v2187_v53 = vand.u32 4294901760, %v2186_v41  ;;  %v6688_v30 = vand.u32 4294901760, %v4821_v51 }
 0x14d   :  { %941 = vmatmul.mubr.f32.gmra.mrb[26].mxu1 %v5499_v39  ;;  %1212 = vmatmul.mubr.f32.gmra.mrb[30].mxu0 %v5568_v47  ;;  %v6507_v47 = vand.u32 4294901760, %v5737_v49  ;;  %v6508_v16 = vand.u32 4294901760, %v5747_v23  ;;  %v6691_v62 = vand.u32 4294901760, %v5642_v54  ;;  %v2208_v44 = vand.u32 4294901760, %v2207_v8 }
 0x14e   :  { %4038 = vmatpush3.bf16.msra.mxu1 %v5700_v52  ;;  %946 = vmatprep.mubr.f32.mxu1 %v6577_v48  ;;  %v3953_v41 = vpack.c.bf16 %v6689_v56, %v6688_v30  ;;  %v4047_v63 = vpack.c.bf16 %v2194_v57, %v2187_v53  ;;  %v6690_v52 = vand.u32 4294901760, %v5640_v25  ;;  %v2201_v56 = vand.u32 4294901760, %v2200_v38 }
 0x14f   :  { %1314 = vmatprep.mubr.f32.mxu0 %v6577_v48  ;;  %4040 = vmatprep.subr.bf16.mxu1 %v5718_v22  ;;  %v5788_v30 = vsub.f32 %v5642_v54, %v6691_v62  ;;  %v2214_v57 = vsub.f32 %v5737_v49, %v6507_v47  ;;  %v6692_v53 = vand.u32 4294901760, %v5742_v18  ;;  %v6694_v54 = vand.u32 4294901760, %v4857_v12 }
 0x150   :  { %v5783_v51 = vsub.f32 %v5640_v25, %v6690_v52  ;;  %v6693_v52 = vand.u32 4294901760, %v4846_v2  ;;  %v2228_v38 = vsub.f32 %v5747_v23, %v6508_v16  ;;  %v6695_v8 = vand.u32 4294901760, %v5750_v9 }
 0x151   :  { %948 = vmatmul.mubr.f32.gmra.mrb[28].mxu1 %v5525_v6  ;;  %1318 = vmatmul.mubr.f32.vlgmr.msra.gmra.mrb[0].mxu0 %v5264_v32  ;;  %v2221_v25 = vsub.f32 %v5742_v18, %v6692_v53  ;;  %v2215_v16 = vand.u32 4294901760, %v2214_v57  ;;  %v6698_v2 = vand.u32 4294901760, %v4861_v19  ;;  %v6699_v12 = vand.u32 4294901760, %v4873_v35 }
 0x152   :  { %4042 = vmatpush3.bf16.msra.mxu1 %v5718_v22  ;;  %953 = vmatprep.mubr.f32.mxu1 %v6577_v48  ;;  %v3955_v62 = vpack.c.bf16 %v6694_v54, %v6693_v52  ;;  %v2235_v47 = vsub.f32 %v5750_v9, %v6695_v8  ;;  %v6697_v52 = vand.u32 4294901760, %v5656_v4  ;;  %v4051_v8 = vpack.c.bf16 %v2208_v44, %v2201_v56 }
 0x153   :  { %1323 = vmatprep.mubr.f32.mxu0 %v6577_v48  ;;  %4044 = vmatprep.subr.bf16.mxu1 %v5758_v31  ;;  %v6701_v56 = vand.u32 4294901760, %v5788_v30 }
 0x154   :  { %3954 = vmatpush1.bf16.msra.mxu0 %v3953_v41  ;;  %v6696_v41 = vand.u32 4294901760, %v5654_v34  ;;  %v5822_v54 = vsub.f32 %v5656_v4, %v6697_v52  ;;  %v6700_v4 = vand.u32 4294901760, %v5783_v51 }
 0x155   :  { %955 = vmatmul.mubr.f32.gmra.mrb[30].mxu1 %v5544_v11  ;;  %1327 = vmatmul.mubr.f32.gmra.mrb[2].mxu0 %v5291_v43  ;;  %v3957_v43 = vpack.c.bf16 %v6699_v12, %v6698_v2  ;;  %v2249_v19 = vsub.f32 %v5788_v30, %v6701_v56 }
 0x156   :  { %4046 = vmatpush3.bf16.msra.mxu1 %v5758_v31  ;;  %3519 = vmatprep.mubr.f32.mxu1 %v5285_v29  ;;  %v5817_v53 = vsub.f32 %v5654_v34, %v6696_v41  ;;  %v2222_v29 = vand.u32 4294901760, %v2221_v25  ;;  %v2229_v34 = vand.u32 4294901760, %v2228_v38  ;;  %v2236_v41 = vand.u32 4294901760, %v2235_v47  ;;  %v6705_v38 = vld [vmem:[#allocation30_spill] sm:$0xff] }
 0x157   :  { %1332 = vmatprep.mubr.f32.mxu0 %v6577_v48  ;;  %4048 = vmatprep.subr.bf16.mxu1 %v4047_v63  ;;  %v2242_v44 = vsub.f32 %v5783_v51, %v6700_v4  ;;  %v6514_v57 = vand.u32 4294901760, %v5822_v54  ;;  %v6702_v47 = vand.u32 4294901760, %v5662_v42  ;;  %v6706_v2 = vand.u32 4294901760, %v6705_v38 }
 0x158   :  { %3956 = vmatprep.subr.bf16.mxu0 %v3955_v62  ;;  %v2255_v35 = vand.u32 4294901760, %v5817_v53  ;;  %v6704_v62 = vand.u32 4294901760, %v4911_v20  ;;  %v2250_v52 = vand.u32 4294901760, %v2249_v19 }
 0x159   :  { %1336 = vmatmul.mubr.f32.gmra.mrb[4].mxu0 %v5281_v36  ;;  %3520 = vmatmul.mubr.f32.vlgmr.msra.gmra.mrb[32].mxu1 %v5311_v3  ;;  %v4055_v3 = vpack.c.bf16 %v2222_v29, %v2215_v16  ;;  %v4059_v16 = vpack.c.bf16 %v2236_v41, %v2229_v34  ;;  %v2263_v20 = vsub.f32 %v5822_v54, %v6514_v57  ;;  %v6708_v29 = vand.u32 4294901760, %v5704_v33  ;;  %v6709_v41 = vld [vmem:[#allocation31_spill] sm:$0xff]  ;;  %v6807_v57 = vld [vmem:[#allocation56_spill] sm:$0xff] }
 0x15a   :  { %4050 = vmatpush3.bf16.msra.mxu1 %v4047_v63  ;;  %3522 = vmatprep.mubr.f32.mxu1 %v5336_v60  ;;  %v5844_v60 = vsub.f32 %v5662_v42, %v6702_v47  ;;  %v6703_v63 = vand.u32 4294901760, %v5664_v17  ;;  %v3959_v12 = vpack.c.bf16 %v6706_v2, %v6704_v62  ;;  %v2243_v42 = vand.u32 4294901760, %v2242_v44  ;;  %v6711_v44 = vld [vmem:[#allocation33_spill] sm:$0xff] }
 0x15b   :  { %1341 = vmatprep.mubr.f32.mxu0 %v6577_v48  ;;  %4052 = vmatprep.subr.bf16.mxu1 %v4051_v8  ;;  %v5875_v34 = vsub.f32 %v5704_v33, %v6708_v29  ;;  %v6710_v4 = vand.u32 4294901760, %v6709_v41  ;;  %v6712_v56 = vand.u32 4294901760, %v6711_v44  ;;  %v6720_v44 = vld [vmem:[#allocation42_spill] sm:$0xff] }
 0x15c   :  { %v5849_v25 = vsub.f32 %v5664_v17, %v6703_v63  ;;  %3958 = vmatpush1.bf16.msra.mxu0 %v3957_v43  ;;  %v2256_v17 = vsub.f32 %v5817_v53, %v2255_v35  ;;  %v6513_v43 = vand.u32 4294901760, %v5844_v60  ;;  %v2264_v63 = vand.u32 4294901760, %v2263_v20 }
 0x15d   :  { %1345 = vmatmul.mubr.f32.gmra.mrb[6].mxu0 %v5314_v37  ;;  %3523 = vmatmul.mubr.f32.gmra.mrb[34].mxu1 %v5361_v0  ;;  %v3961_v19 = vpack.c.bf16 %v6712_v56, %v6710_v4  ;;  %v6721_v56 = vand.u32 4294901760, %v6720_v44 }
 0x15e   :  { %4054 = vmatpush3.bf16.msra.mxu1 %v4051_v8  ;;  %3525 = vmatprep.mubr.f32.mxu1 %v5384_v28  ;;  %v6512_v0 = vand.u32 4294901760, %v5849_v25  ;;  %v6707_v8 = vand.u32 4294901760, %v5702_v55  ;;  %v2257_v47 = vand.u32 4294901760, %v2256_v17  ;;  %v2270_v33 = vsub.f32 %v5844_v60, %v6513_v43  ;;  %v6715_v17 = vld [vmem:[#allocation36_spill] sm:$0xff] }
 0x15f   :  { %1350 = vmatprep.mubr.f32.mxu0 %v6577_v48  ;;  %4056 = vmatprep.subr.bf16.mxu1 %v4055_v3 }
 0x160   :  { %v5870_v28 = vsub.f32 %v5702_v55, %v6707_v8  ;;  %3960 = vmatprep.subr.bf16.mxu0 %v3959_v12  ;;  %v4063_v55 = vpack.c.bf16 %v2250_v52, %v2243_v42  ;;  %v2277_v62 = vsub.f32 %v5849_v25, %v6512_v0  ;;  %v4067_v12 = vpack.c.bf16 %v2264_v63, %v2257_v47  ;;  %v6719_v8 = vld [vmem:[#allocation41_spill] sm:$0xff]  ;;  %v6799_v0 = vld [vmem:[#allocation48_spill] sm:$0xff] }
 0x161   :  { %1354 = vmatmul.mubr.f32.gmra.mrb[8].mxu0 %v5342_v46  ;;  %3526 = vmatmul.mubr.f32.gmra.mrb[36].mxu1 %v5406_v40  ;;  %v6510_v40 = vand.u32 4294901760, %v5875_v34  ;;  %v2271_v42 = vand.u32 4294901760, %v2270_v33  ;;  %v6724_v33 = vld [vmem:[#allocation19_spill] sm:$0xff] }
 0x162   :  { %4058 = vmatpush3.bf16.msra.mxu1 %v4055_v3  ;;  %3528 = vmatprep.mubr.f32.mxu1 %v5430_v58  ;;  %v6511_v38 = vand.u32 4294901760, %v5870_v28  ;;  %v6713_v58 = vand.u32 4294901760, %v4960_v7  ;;  %v6714_v3 = vand.u32 4294901760, %v4963_v13  ;;  %v2278_v52 = vand.u32 4294901760, %v2277_v62  ;;  %v6727_v62 = vld [vmem:[#allocation47_spill] sm:$0xff] }
 0x163   :  { %1359 = vmatprep.mubr.f32.mxu0 %v6577_v48  ;;  %4060 = vmatprep.subr.bf16.mxu1 %v4059_v16  ;;  %v2291_v13 = vsub.f32 %v5875_v34, %v6510_v40  ;;  %v6791_v40 = vld [vmem:[#allocation40_spill] sm:$0xff] }
 0x164   :  { %3962 = vmatpush1.bf16.msra.mxu0 %v3961_v19  ;;  %v3963_v2 = vpack.c.bf16 %v6714_v3, %v6713_v58  ;;  %v2284_v7 = vsub.f32 %v5870_v28, %v6511_v38  ;;  %v4071_v29 = vpack.c.bf16 %v2278_v52, %v2271_v42  ;;  %v6722_v19 = vld [vmem:[#allocation44_spill] sm:$0xff]  ;;  %v6728_v58 = vand.u32 4294901760, %v6727_v62  ;;  %v6730_v42 = vld [vmem:[#allocation93_spill] sm:$0xff]  ;;  %v6795_v38 = vld [vmem:[#allocation46_spill] sm:$0xff] }
 0x165   :  { %1363 = vmatmul.mubr.f32.gmra.mrb[10].mxu0 %v5357_v45  ;;  %3529 = vmatmul.mubr.f32.gmra.mrb[38].mxu1 %v5452_v26  ;;  %v6716_v26 = vand.u32 4294901760, %v6715_v17  ;;  %v2292_v4 = vand.u32 4294901760, %v2291_v13  ;;  %v6723_v47 = vand.u32 4294901760, %v6722_v19  ;;  %v6731_v52 = vld [vmem:[#allocation24_spill] sm:$0xff]  ;;  %v6743_v19 = vld [vmem:[#allocation57_spill] sm:$0xff] }
 0x166   :  { %4062 = vmatpush3.bf16.msra.mxu1 %v4059_v16  ;;  %3531 = vmatprep.mubr.f32.mxu1 %v5480_v24  ;;  %v6717_v16 = vld [vmem:[#allocation37_spill] sm:$0xff]  ;;  %v2285_v41 = vand.u32 4294901760, %v2284_v7  ;;  %v6734_v7 = vld [vmem:[#allocation51_spill] sm:$0xff]  ;;  %v6748_v62 = vld [vmem:[#allocation60_spill] sm:$0xff] }
 0x167   :  { %1368 = vmatprep.mubr.f32.mxu0 %v6577_v48  ;;  %4064 = vmatprep.subr.bf16.mxu1 %v4063_v55  ;;  %v6718_v20 = vand.u32 4294901760, %v6717_v16  ;;  %v3967_v63 = vpack.c.bf16 %v6723_v47, %v6721_v56  ;;  %v6735_v13 = vand.u32 4294901760, %v6734_v7  ;;  %v6737_v16 = vld [vmem:[#allocation25_spill] sm:$0xff]  ;;  %v6744_v47 = vld [vmem:[#allocation78_spill] sm:$0xff] }
 0x168   :  { %3964 = vmatprep.subr.bf16.mxu0 %v3963_v2  ;;  %v6729_v2 = vld [vmem:[#allocation20_spill] sm:$0xff] }
 0x169   :  { %v3965_v24 = vpack.c.bf16 %v6718_v20, %v6716_v26  ;;  %1372 = vmatmul.mubr.f32.gmra.mrb[12].mxu0 %v6719_v8  ;;  %3532 = vmatmul.mubr.f32.gmra.mrb[40].mxu1 %v5502_v15  ;;  %v4075_v15 = vpack.c.bf16 %v2292_v4, %v2285_v41  ;;  %v6736_v26 = vld [vmem:[#allocation21_spill] sm:$0xff]  ;;  %v6738_v20 = vld [vmem:[#allocation74_spill] sm:$0xff] }
 0x16a   :  { %4066 = vmatpush3.bf16.msra.mxu1 %v4063_v55  ;;  %3534 = vmatprep.mubr.f32.mxu1 %v5521_v50  ;;  %v6725_v50 = vld [vmem:[#allocation45_spill] sm:$0xff] }
 0x16b   :  { %1377 = vmatprep.mubr.f32.mxu0 %v6577_v48  ;;  %4068 = vmatprep.subr.bf16.mxu1 %v4067_v12  ;;  %v6726_v55 = vand.u32 4294901760, %v6725_v50  ;;  %v6741_v4 = vld [vmem:[#allocation53_spill] sm:$0xff]  ;;  %v6746_v50 = vld [vmem:[#allocation58_spill] sm:$0xff] }
 0x16c   :  { %3966 = vmatpush1.bf16.msra.mxu0 %v3965_v24  ;;  %v4083_v24 = vpack.c.bf16 %v5710_v27, %v5707_v1  ;;  %v6742_v44 = vand.u32 4294901760, %v6741_v4  ;;  %v4095_v4 = vpack.c.bf16 %v5788_v30, %v5783_v51 }
 0x16d   :  { %1381 = vmatmul.mubr.f32.gmra.mrb[14].mxu0 %v6724_v33  ;;  %3535 = vmatmul.mubr.f32.gmra.mrb[42].mxu1 %v5542_v10  ;;  %v3969_v3 = vpack.c.bf16 %v6728_v58, %v6726_v55  ;;  %v4079_v10 = vpack.c.bf16 %v5674_v61, %v5669_v14  ;;  %v6747_v55 = vand.u32 4294901760, %v6746_v50  ;;  %v6749_v58 = vand.u32 4294901760, %v6748_v62  ;;  %v6762_v50 = vld [vmem:[#allocation67_spill] sm:$0xff] }
 0x16e   :  { %4070 = vmatpush3.bf16.msra.mxu1 %v4067_v12  ;;  %3537 = vmatprep.mubr.f32.mxu1 %v5560_v59  ;;  %v6732_v59 = vld [vmem:[#allocation50_spill] sm:$0xff] }
 0x16f   :  { %1386 = vmatprep.mubr.f32.mxu0 %v6577_v48  ;;  %4072 = vmatprep.subr.bf16.mxu1 %v4071_v29  ;;  %v6733_v12 = vand.u32 4294901760, %v6732_v59  ;;  %v4091_v59 = vpack.c.bf16 %v5750_v9, %v5747_v23 }
 0x170   :  { %3968 = vmatprep.subr.bf16.mxu0 %v3967_v63  ;;  %v6745_v63 = vld [vmem:[#allocation75_spill] sm:$0xff] }
 0x171   :  { %1390 = vmatmul.mubr.f32.gmra.mrb[16].mxu0 %v6729_v2  ;;  %3538 = vmatmul.mubr.f32.gmra.mrb[44].mxu1 %v6730_v42  ;;  %v3971_v17 = vpack.c.bf16 %v6735_v13, %v6733_v12  ;;  %v6750_v42 = vld [vmem:[#allocation22_spill] sm:$0xff]  ;;  %v6753_v12 = vld [vmem:[#allocation61_spill] sm:$0xff]  ;;  %v6755_v13 = vld [vmem:[#allocation63_spill] sm:$0xff] }
 0x172   :  { %4074 = vmatpush3.bf16.msra.mxu1 %v4071_v29  ;;  %3540 = vmatprep.mubr.f32.mxu1 %v6731_v52  ;;  %v6739_v29 = vld [vmem:[#allocation52_spill] sm:$0xff]  ;;  %v6751_v52 = vld [vmem:[#allocation79_spill] sm:$0xff]  ;;  %v6754_v7 = vand.u32 4294901760, %v6753_v12  ;;  %v4099_v12 = vpack.c.bf16 %v5822_v54, %v5817_v53 }
 0x173   :  { %1395 = vmatprep.mubr.f32.mxu0 %v6577_v48  ;;  %4076 = vmatprep.subr.bf16.mxu1 %v4075_v15  ;;  %v6740_v41 = vand.u32 4294901760, %v6739_v29  ;;  %v6757_v29 = vld [vmem:[#allocation26_spill] sm:$0xff] }
 0x174   :  { %3970 = vmatpush1.bf16.msra.mxu0 %v3969_v3  ;;  %v3975_v3 = vpack.c.bf16 %v6749_v58, %v6747_v55  ;;  %v6763_v55 = vand.u32 4294901760, %v6762_v50  ;;  %v6764_v58 = vld [vmem:[#allocation89_spill] sm:$0xff]  ;;  %v6772_v50 = vld [vmem:[#allocation43_spill] sm:$0xff] }
 0x175   :  { %1399 = vmatmul.mubr.f32.gmra.mrb[18].mxu0 %v6736_v26  ;;  %3541 = vmatmul.mubr.f32.gmra.mrb[46].mxu1 %v6737_v16  ;;  %v3973_v56 = vpack.c.bf16 %v6742_v44, %v6740_v41  ;;  %v6758_v41 = vld [vmem:[#allocation84_spill] sm:$0xff]  ;;  %v6760_v44 = vld [vmem:[#allocation66_spill] sm:$0xff] }
 0x176   :  { %4078 = vmatpush3.bf16.msra.mxu1 %v4075_v15  ;;  %3575 = vmatprep.mubr.f32.mxu1 %v6738_v20  ;;  %v4087_v15 = vpack.c.bf16 %v5742_v18, %v5737_v49 }
 0x177   :  { %1404 = vmatprep.mubr.f32.mxu0 %v6577_v48  ;;  %4080 = vmatprep.subr.bf16.mxu1 %v4079_v10 }
 0x178   :  { %3972 = vmatprep.subr.bf16.mxu0 %v3971_v17  ;;  %v6756_v17 = vand.u32 4294901760, %v6755_v13 }
 0x179   :  { %1408 = vmatmul.mubr.f32.gmra.mrb[20].mxu0 %v6743_v19  ;;  %3576 = vmatmul.mubr.f32.vlgmr.msra.gmra.mrb[32].mxu1 %v6744_v47 }
 0x17a   :  { %4082 = vmatpush3.bf16.msra.mxu1 %v4079_v10  ;;  %3578 = vmatprep.mubr.f32.mxu1 %v6745_v63  ;;  %v6752_v10 = vld [vmem:[#allocation81_spill] sm:$0xff]  ;;  %v3977_v16 = vpack.c.bf16 %v6756_v17, %v6754_v7  ;;  %v6767_v7 = vld [vmem:[#allocation68_spill] sm:$0xff] }
 0x17b   :  { %1413 = vmatprep.mubr.f32.mxu0 %v6577_v48  ;;  %4084 = vmatprep.subr.bf16.mxu1 %v4083_v24  ;;  %v6768_v13 = vand.u32 4294901760, %v6767_v7  ;;  %v6769_v17 = vld [vmem:[#allocation69_spill] sm:$0xff]  ;;  %v6775_v7 = vld [vmem:[#allocation27_spill] sm:$0xff] }
 0x17c   :  { %3974 = vmatpush1.bf16.msra.mxu0 %v3973_v56  ;;  %v6761_v56 = vand.u32 4294901760, %v6760_v44 }
 0x17d   :  { %1417 = vmatmul.mubr.f32.gmra.mrb[22].mxu0 %v6750_v42  ;;  %3579 = vmatmul.mubr.f32.gmra.mrb[34].mxu1 %v6751_v52 }
 0x17e   :  { %4086 = vmatpush3.bf16.msra.mxu1 %v4083_v24  ;;  %3581 = vmatprep.mubr.f32.mxu1 %v6752_v10  ;;  %v6759_v24 = vld [vmem:[#allocation16_spill] sm:$0xff]  ;;  %v3979_v62 = vpack.c.bf16 %v6763_v55, %v6761_v56  ;;  %v6771_v56 = vld [vmem:[#allocation91_spill] sm:$0xff]  ;;  %v4103_v55 = vpack.c.bf16 %v5849_v25, %v5844_v60 }
 0x17f   :  { %1422 = vmatprep.mubr.f32.mxu0 %v6577_v48  ;;  %4088 = vmatprep.subr.bf16.mxu1 %v4087_v15 }
 0x180   :  { %3976 = vmatprep.subr.bf16.mxu0 %v3975_v3  ;;  %v6765_v3 = vld [vmem:[#allocation35_spill] sm:$0xff] }
 0x181   :  { %1426 = vmatmul.mubr.f32.gmra.mrb[24].mxu0 %v6757_v29  ;;  %3582 = vmatmul.mubr.f32.gmra.mrb[36].mxu1 %v6758_v41 }
 0x182   :  { %4090 = vmatpush3.bf16.msra.mxu1 %v4087_v15  ;;  %3584 = vmatprep.mubr.f32.mxu1 %v6759_v24  ;;  %v6766_v15 = vld [vmem:[#allocation17_spill] sm:$0xff] }
 0x183   :  { %1431 = vmatprep.mubr.f32.mxu0 %v6577_v48  ;;  %4092 = vmatprep.subr.bf16.mxu1 %v4091_v59 }
 0x184   :  { %3978 = vmatpush1.bf16.msra.mxu0 %v3977_v16  ;;  %v6770_v16 = vand.u32 4294901760, %v6769_v17  ;;  %v6778_v17 = vld [vmem:[#allocation23_spill] sm:$0xff] }
 0x185   :  { %1435 = vmatmul.mubr.f32.gmra.mrb[26].mxu0 %v6764_v58  ;;  %3585 = vmatmul.mubr.f32.gmra.mrb[38].mxu1 %v6765_v3 }
 0x186   :  { %4094 = vmatpush3.bf16.msra.mxu1 %v4091_v59  ;;  %3587 = vmatprep.mubr.f32.mxu1 %v6766_v15  ;;  %v3981_v44 = vpack.c.bf16 %v6770_v16, %v6768_v13  ;;  %v6773_v59 = vld [vmem:[#allocation49_spill] sm:$0xff]  ;;  %v6777_v13 = vld [vmem:[#allocation76_spill] sm:$0xff] }
 0x187   :  { %1440 = vmatprep.mubr.f32.mxu0 %v6577_v48  ;;  %4096 = vmatprep.subr.bf16.mxu1 %v4095_v4  ;;  %v6779_v16 = vld [vmem:[#allocation32_spill] sm:$0xff] }
 0x188   :  { %3980 = vmatprep.subr.bf16.mxu0 %v3979_v62  ;;  %v6774_v62 = vld [vmem:[#allocation94_spill] sm:$0xff] }
 0x189   :  { %1444 = vmatmul.mubr.f32.gmra.mrb[28].mxu0 %v6771_v56  ;;  %3588 = vmatmul.mubr.f32.gmra.mrb[40].mxu1 %v6772_v50 }
 0x18a   :  { %4098 = vmatpush3.bf16.msra.mxu1 %v4095_v4  ;;  %3590 = vmatprep.mubr.f32.mxu1 %v6773_v59  ;;  %v4107_v4 = vpack.c.bf16 %v5875_v34, %v5870_v28 }
 0x18b   :  { %1449 = vmatprep.mubr.f32.mxu0 %v6577_v48  ;;  %4100 = vmatprep.subr.bf16.mxu1 %v4099_v12 }
 0x18c   :  { %3982 = vmatpush1.bf16.msra.mxu0 %v3981_v44  ;;  %v6780_v44 = vld [vmem:[#allocation80_spill] sm:$0xff] }
 0x18d   :  { %1453 = vmatmul.mubr.f32.gmra.mrb[30].mxu0 %v6774_v62  ;;  %3591 = vmatmul.mubr.f32.gmra.mrb[42].mxu1 %v5444_v5 }
 0x18e   :  { %4102 = vmatpush3.bf16.msra.mxu1 %v4099_v12  ;;  %3593 = vmatprep.mubr.f32.mxu1 %v5477_v21  ;;  %v6776_v12 = vld [vmem:[#allocation28_spill] sm:$0xff] }
 0x18f   :  { %1619 = vmatprep.mubr.f32.mxu0 %v6577_v48  ;;  %4104 = vmatprep.subr.bf16.mxu1 %v4103_v55 }
 0x190   :  { %3984 = vmatprep.subr.bf16.mxu0 %v6775_v7  ;;  %v6782_v7 = vld [vmem:[#allocation95_spill] sm:$0xff] }
 0x191   :  { %1621 = vmatmul.mubr.f32.vlgmr.msra.gmra.mrb[0].mxu0 %v6738_v20  ;;  %3594 = vmatmul.mubr.f32.gmra.mrb[44].mxu1 %v5499_v39 }
 0x192   :  { %4106 = vmatpush3.bf16.msra.mxu1 %v4103_v55  ;;  %3596 = vmatprep.mubr.f32.mxu1 %v5525_v6  ;;  %v6781_v55 = vld [vmem:[#allocation77_spill] sm:$0xff] }
 0x193   :  { %1626 = vmatprep.mubr.f32.mxu0 %v6577_v48  ;;  %4108 = vmatprep.subr.bf16.mxu1 %v4107_v4 }
 0x194   :  { %3986 = vmatpush1.bf16.msra.mxu0 %v6776_v12  ;;  %v6784_v12 = vld [vmem:[#allocation83_spill] sm:$0xff] }
 0x195   :  { %1628 = vmatmul.mubr.f32.gmra.mrb[2].mxu0 %v6744_v47  ;;  %3597 = vmatmul.mubr.f32.gmra.mrb[46].mxu1 %v5544_v11 }
 0x196   :  { %4110 = vmatpush3.bf16.msra.mxu1 %v4107_v4  ;;  %3631 = vmatprep.mubr.f32.mxu1 %v6777_v13  ;;  %v6783_v4 = vld [vmem:[#allocation34_spill] sm:$0xff]  ;;  %v6785_v13 = vld [vmem:[#allocation85_spill] sm:$0xff] }
 0x197   :  { %1633 = vmatprep.mubr.f32.mxu0 %v6577_v48  ;;  %4112 = vmatprep.subr.bf16.mxu1 %v6778_v17 }
 0x198   :  { %3988 = vmatprep.subr.bf16.mxu0 %v6779_v16  ;;  %v6786_v16 = vld [vmem:[#allocation96_spill] sm:$0xff] }
 0x199   :  { %1635 = vmatmul.mubr.f32.gmra.mrb[4].mxu0 %v6745_v63  ;;  %3632 = vmatmul.mubr.f32.vlgmr.msra.gmra.mrb[32].mxu1 %v6780_v44  ;;  %v6787_v44 = vld [vmem:[#allocation38_spill] sm:$0xff] }
 0x19a   :  { %4114 = vmatpush3.bf16.msra.mxu1 %v6778_v17  ;;  %3634 = vmatprep.mubr.f32.mxu1 %v6781_v55  ;;  %v6788_v55 = vld [vmem:[#allocation29_spill] sm:$0xff] }
 0x19b   :  { %1640 = vmatprep.mubr.f32.mxu0 %v6577_v48  ;;  %4116 = vmatprep.subr.bf16.mxu1 %v6782_v7 }
 0x19c   :  { %3990 = vmatpush1.bf16.msra.mxu0 %v6783_v4  ;;  %v6789_v4 = vld [vmem:[#allocation39_spill] sm:$0xff] }
 0x19d   :  { %1642 = vmatmul.mubr.f32.gmra.mrb[6].mxu0 %v6751_v52  ;;  %3635 = vmatmul.mubr.f32.gmra.mrb[34].mxu1 %v6784_v12  ;;  %v6790_v12 = vld [vmem:[#allocation97_spill] sm:$0xff] }
 0x19e   :  { %4118 = vmatpush3.bf16.msra.mxu1 %v6782_v7  ;;  %3637 = vmatprep.mubr.f32.mxu1 %v6785_v13  ;;  %v6792_v13 = vld [vmem:[#allocation18_spill] sm:$0xff] }
 0x19f   :  { %1647 = vmatprep.mubr.f32.mxu0 %v6577_v48  ;;  %4120 = vmatprep.subr.bf16.mxu1 %v6786_v16 }
 0x1a0   :  { %3992 = vmatprep.subr.bf16.mxu0 %v6787_v44  ;;  %v6793_v44 = vld [vmem:[#allocation86_spill] sm:$0xff] }
 0x1a1   :  { %1649 = vmatmul.mubr.f32.gmra.mrb[8].mxu0 %v6752_v10  ;;  %3638 = vmatmul.mubr.f32.gmra.mrb[36].mxu1 %v6788_v55  ;;  %v6794_v55 = vld [vmem:[#allocation98_spill] sm:$0xff] }
 0x1a2   :  { %4122 = vmatpush3.bf16.msra.mxu1 %v6786_v16  ;;  %3640 = vmatprep.mubr.f32.mxu1 %v6789_v4  ;;  %v6796_v4 = vld [vmem:[#allocation87_spill] sm:$0xff] }
 0x1a3   :  { %1654 = vmatprep.mubr.f32.mxu0 %v6577_v48  ;;  %4124 = vmatprep.subr.bf16.mxu1 %v6790_v12 }
 0x1a4   :  { %3994 = vmatpush1.bf16.msra.mxu0 %v6791_v40  ;;  %v6797_v40 = vld [vmem:[#allocation55_spill] sm:$0xff] }
 0x1a5   :  { %1656 = vmatmul.mubr.f32.gmra.mrb[10].mxu0 %v6758_v41  ;;  %3641 = vmatmul.mubr.f32.gmra.mrb[38].mxu1 %v6792_v13  ;;  %v6798_v13 = vld [vmem:[#allocation99_spill] sm:$0xff] }
 0x1a6   :  { %4126 = vmatpush3.bf16.msra.mxu1 %v6790_v12  ;;  %3643 = vmatprep.mubr.f32.mxu1 %v6793_v44  ;;  %v6800_v44 = vld [vmem:[#allocation59_spill] sm:$0xff] }
 0x1a7   :  { %1661 = vmatprep.mubr.f32.mxu0 %v6577_v48  ;;  %4128 = vmatprep.subr.bf16.mxu1 %v6794_v55 }
 0x1a8   :  { %3996 = vmatprep.subr.bf16.mxu0 %v6795_v38  ;;  %v6801_v38 = vld [vmem:[#allocation65_spill] sm:$0xff] }
 0x1a9   :  { %1663 = vmatmul.mubr.f32.gmra.mrb[12].mxu0 %v6759_v24  ;;  %3644 = vmatmul.mubr.f32.gmra.mrb[40].mxu1 %v6796_v4  ;;  %v6802_v4 = vld [vmem:[#allocation54_spill] sm:$0xff] }
 0x1aa   :  { %4130 = vmatpush3.bf16.msra.mxu1 %v6794_v55  ;;  %3646 = vmatprep.mubr.f32.mxu1 %v6797_v40  ;;  %v6803_v40 = vld [vmem:[#allocation88_spill] sm:$0xff] }
 0x1ab   :  { %1668 = vmatprep.mubr.f32.mxu0 %v6577_v48  ;;  %4132 = vmatprep.subr.bf16.mxu1 %v6798_v13 }
 0x1ac   :  { %3998 = vmatpush1.bf16.msra.mxu0 %v6799_v0  ;;  %v6804_v0 = vld [vmem:[#allocation90_spill] sm:$0xff] }
 0x1ad   :  { %1670 = vmatmul.mubr.f32.gmra.mrb[14].mxu0 %v6765_v3  ;;  %3647 = vmatmul.mubr.f32.gmra.mrb[42].mxu1 %v6800_v44  ;;  %v6805_v44 = vand.u32 4294901760, %v5669_v14  ;;  %v6810_v14 = vand.u32 4294901760, %v5710_v27  ;;  %v6817_v27 = vand.u32 4294901760, %v5750_v9 }
 0x1ae   :  { %4134 = vmatpush3.bf16.msra.mxu1 %v6798_v13  ;;  %3649 = vmatprep.mubr.f32.mxu1 %v6801_v38  ;;  %v6806_v38 = vand.u32 4294901760, %v5674_v61  ;;  %v6811_v61 = vld [vmem:[#allocation62_spill] sm:$0xff] }
 0x1af   :  { %1675 = vmatprep.mubr.f32.mxu0 %v6577_v48  ;;  %4136 = vmatprep.subr.bf16.mxu1 %v5718_v22 }
 0x1b0   :  { %4000 = vmatprep.subr.bf16.mxu0 %v6802_v4  ;;  %v4143_v43 = vpack.c.bf16 %v6806_v38, %v6805_v44  ;;  %v6808_v4 = vld [vmem:[#allocation92_spill] sm:$0xff]  ;;  %v6814_v44 = vand.u32 4294901760, %v5742_v18 }
 0x1b1   :  { %1677 = vmatmul.mubr.f32.gmra.mrb[16].mxu0 %v6766_v15  ;;  %3650 = vmatmul.mubr.f32.gmra.mrb[44].mxu1 %v6803_v40  ;;  %v6809_v40 = vand.u32 4294901760, %v5707_v1  ;;  %v6815_v38 = vld [vmem:[#allocation64_spill] sm:$0xff] }
 0x1b2   :  { %4138 = vmatpush3.bf16.msra.mxu1 %v5718_v22  ;;  %3652 = vmatprep.mubr.f32.mxu1 %v6804_v0 }
 0x1b3   :  { %1682 = vmatprep.mubr.f32.mxu0 %v6577_v48  ;;  %4140 = vmatprep.subr.bf16.mxu1 %v5758_v31  ;;  %v4147_v0 = vpack.c.bf16 %v6810_v14, %v6809_v40 }
 0x1b4   :  { %4002 = vmatpush1.bf16.msra.mxu0 %v6807_v57  ;;  %v6812_v57 = vld [vmem:[#allocation82_spill] sm:$0xff] }
 0x1b5   :  { %1684 = vmatmul.mubr.f32.gmra.mrb[18].mxu0 %v6772_v50  ;;  %3653 = vmatmul.mubr.f32.gmra.mrb[46].mxu1 %v6808_v4 }
 0x1b6   :  { %4142 = vmatpush3.bf16.msra.mxu1 %v5758_v31  ;;  %3687 = vmatprep.mubr.f32.mxu1 %v5264_v32  ;;  %v6813_v32 = vand.u32 4294901760, %v5737_v49 }
 0x1b7   :  { %1689 = vmatprep.mubr.f32.mxu0 %v6577_v48  ;;  %4144 = vmatprep.subr.bf16.mxu1 %v4143_v43 }
 0x1b8   :  { %4004 = vmatprep.subr.bf16.mxu0 %v6811_v61  ;;  %v4151_v1 = vpack.c.bf16 %v6814_v44, %v6813_v32 }
 0x1b9   :  { %1691 = vmatmul.mubr.f32.gmra.mrb[20].mxu0 %v6773_v59  ;;  %3688 = vmatmul.mubr.f32.vlgmr.msra.gmra.mrb[32].mxu1 %v6812_v57 }
 0x1ba   :  { %4146 = vmatpush3.bf16.msra.mxu1 %v4143_v43  ;;  %3690 = vmatprep.mubr.f32.mxu1 %v5281_v36  ;;  %v6816_v36 = vand.u32 4294901760, %v5747_v23  ;;  %v6818_v43 = vld [vmem:[#allocation70_spill] sm:$0xff]  ;;  %v6821_v23 = vld [vmem:[#allocation71_spill] sm:$0xff] }
 0x1bb   :  { %1696 = vmatprep.mubr.f32.mxu0 %v6577_v48  ;;  %4148 = vmatprep.subr.bf16.mxu1 %v4147_v0 }
 0x1bc   :  { %4006 = vmatpush1.bf16.msra.mxu0 %v6815_v38  ;;  %v4155_v49 = vpack.c.bf16 %v6817_v27, %v6816_v36 }
 0x1bd   :  { %1698 = vmatmul.mubr.f32.gmra.mrb[22].mxu0 %v5444_v5  ;;  %3691 = vmatmul.mubr.f32.gmra.mrb[34].mxu1 %v5314_v37  ;;  %v6819_v37 = vand.u32 4294901760, %v5783_v51  ;;  %v6823_v51 = vld [vmem:[#allocation72_spill] sm:$0xff] }
 0x1be   :  { %4150 = vmatpush3.bf16.msra.mxu1 %v4147_v0  ;;  %3693 = vmatprep.mubr.f32.mxu1 %v5342_v46  ;;  %v6820_v46 = vand.u32 4294901760, %v5788_v30  ;;  %v6824_v30 = vand.u32 4294901760, %v5844_v60  ;;  %v6827_v60 = vand.u32 4294901760, %v5870_v28 }
 0x1bf   :  { %1703 = vmatprep.mubr.f32.mxu0 %v6577_v48  ;;  %4152 = vmatprep.subr.bf16.mxu1 %v4151_v1 }
 0x1c0   :  { %4008 = vmatprep.subr.bf16.mxu0 %v6818_v43  ;;  %v4159_v18 = vpack.c.bf16 %v6820_v46, %v6819_v37 }
 0x1c1   :  { %1705 = vmatmul.mubr.f32.gmra.mrb[24].mxu0 %v5477_v21  ;;  %3694 = vmatmul.mubr.f32.gmra.mrb[36].mxu1 %v5357_v45  ;;  %v6822_v45 = vand.u32 4294901760, %v5822_v54  ;;  %v6826_v54 = vld [vmem:[#allocation73_spill] sm:$0xff] }
 0x1c2   :  { %4154 = vmatpush3.bf16.msra.mxu1 %v4151_v1  ;;  %3696 = vmatprep.mubr.f32.mxu1 %v6719_v8  ;;  %v6825_v8 = vand.u32 4294901760, %v5849_v25  ;;  %v6828_v25 = vand.u32 4294901760, %v5875_v34 }
 0x1c3   :  { %1710 = vmatprep.mubr.f32.mxu0 %v6577_v48  ;;  %4156 = vmatprep.subr.bf16.mxu1 %v4155_v49  ;;  %v4163_v9 = vpack.c.bf16 %v6822_v45, %v2255_v35 }
 0x1c4   :  { %4010 = vmatpush1.bf16.msra.mxu0 %v6821_v23  ;;  %v4167_v53 = vpack.c.bf16 %v6825_v8, %v6824_v30 }
 0x1c5   :  { %1712 = vmatmul.mubr.f32.gmra.mrb[26].mxu0 %v5499_v39  ;;  %3697 = vmatmul.mubr.f32.gmra.mrb[38].mxu1 %v6724_v33 }
 0x1c6   :  { %4158 = vmatpush3.bf16.msra.mxu1 %v4155_v49  ;;  %3699 = vmatprep.mubr.f32.mxu1 %v6729_v2  ;;  %v4171_v2 = vpack.c.bf16 %v6828_v25, %v6827_v60 }
 0x1c7   :  { %1717 = vmatprep.mubr.f32.mxu0 %v6577_v48  ;;  %4160 = vmatprep.subr.bf16.mxu1 %v4159_v18 }
 0x1c8   :  { %4012 = vmatprep.subr.bf16.mxu0 %v6823_v51 }
 0x1c9   :  { %1719 = vmatmul.mubr.f32.gmra.mrb[28].mxu0 %v5525_v6  ;;  %3700 = vmatmul.mubr.f32.gmra.mrb[40].mxu1 %v6736_v26 }
 0x1ca   :  { %4162 = vmatpush3.bf16.msra.mxu1 %v4159_v18  ;;  %3702 = vmatprep.mubr.f32.mxu1 %v6743_v19 }
 0x1cb   :  { %1724 = vmatprep.mubr.f32.mxu0 %v6577_v48  ;;  %4164 = vmatprep.subr.bf16.mxu1 %v4163_v9 }
 0x1cc   :  { %v6118_v33 = vpop.f32.mrb[0].mxu1  ;;  %4014 = vmatpush1.bf16.msra.mxu0 %v6826_v54 }
 0x1cd   :  { %v6121_v35 = vpop.f32.mrb[1].mxu1  ;;  %1726 = vmatmul.mubr.f32.gmra.mrb[30].mxu0 %v5544_v11  ;;  %3703 = vmatmul.mubr.f32.gmra.mrb[42].mxu1 %v6750_v42 }
 0x1ce   :  { %4166 = vmatpush3.bf16.msra.mxu1 %v4163_v9  ;;  %3705 = vmatprep.mubr.f32.mxu1 %v6757_v29 }
 0x1cf   :  { %1828 = vmatprep.mubr.f32.mxu0 %v6577_v48  ;;  %4168 = vmatprep.subr.bf16.mxu1 %v4167_v53 }
 0x1d0   :  { %v6131_v26 = vpop.f32.mrb[2].mxu1 }
 0x1d1   :  { %v6133_v19 = vpop.f32.mrb[3].mxu1  ;;  %1830 = vmatmul.mubr.f32.vlgmr.msra.gmra.mrb[0].mxu0 %v6738_v20  ;;  %3706 = vmatmul.mubr.f32.gmra.mrb[44].mxu1 %v6764_v58 }
 0x1d2   :  { %4170 = vmatpush3.bf16.msra.mxu1 %v4167_v53  ;;  %3708 = vmatprep.mubr.f32.mxu1 %v6771_v56 }
 0x1d3   :  { %1835 = vmatprep.mubr.f32.mxu0 %v6577_v48  ;;  %4172 = vmatprep.subr.bf16.mxu1 %v4171_v2 }
 0x1d4   :  { %v6139_v42 = vpop.f32.mrb[4].mxu1 }
 0x1d5   :  { %v6141_v28 = vpop.f32.mrb[5].mxu1  ;;  %1837 = vmatmul.mubr.f32.gmra.mrb[2].mxu0 %v6744_v47  ;;  %3709 = vmatmul.mubr.f32.gmra.mrb[46].mxu1 %v6774_v62 }
 0x1d6   :  { %4174 = vmatpush3.bf16.msra.mxu1 %v4171_v2  ;;  %3743 = vmatprep.mubr.f32.mxu1 %v6738_v20 }
 0x1d7   :  { %1842 = vmatprep.mubr.f32.mxu0 %v6577_v48  ;;  %4176 = vmatprep.subr.bf16.mxu1 %v6778_v17 }
 0x1d8   :  { %v6148_v34 = vpop.f32.mrb[6].mxu1 }
 0x1d9   :  { %v6150_v29 = vpop.f32.mrb[7].mxu1  ;;  %1844 = vmatmul.mubr.f32.gmra.mrb[4].mxu0 %v6745_v63  ;;  %3744 = vmatmul.mubr.f32.vlgmr.msra.gmra.mrb[32].mxu1 %v6744_v47 }
 0x1da   :  { %4178 = vmatpush3.bf16.msra.mxu1 %v6778_v17  ;;  %3746 = vmatprep.mubr.f32.mxu1 %v6745_v63 }
 0x1db   :  { %1849 = vmatprep.mubr.f32.mxu0 %v6577_v48  ;;  %4180 = vmatprep.subr.bf16.mxu1 %v6782_v7 }
 0x1dc   :  { %v6158_v58 = vpop.f32.mrb[8].mxu1 }
 0x1dd   :  { %v6160_v56 = vpop.f32.mrb[9].mxu1  ;;  %1851 = vmatmul.mubr.f32.gmra.mrb[6].mxu0 %v6751_v52  ;;  %3747 = vmatmul.mubr.f32.gmra.mrb[34].mxu1 %v6751_v52 }
 0x1de   :  { %4182 = vmatpush3.bf16.msra.mxu1 %v6782_v7  ;;  %3749 = vmatprep.mubr.f32.mxu1 %v6752_v10 }
 0x1df   :  { %1856 = vmatprep.mubr.f32.mxu0 %v6577_v48  ;;  %4184 = vmatprep.subr.bf16.mxu1 %v6786_v16 }
 0x1e0   :  { %v6168_v62 = vpop.f32.mrb[10].mxu1 }
 0x1e1   :  { %v6170_v17 = vpop.f32.mrb[11].mxu1  ;;  %1858 = vmatmul.mubr.f32.gmra.mrb[8].mxu0 %v6752_v10  ;;  %3750 = vmatmul.mubr.f32.gmra.mrb[36].mxu1 %v6758_v41 }
 0x1e2   :  { %4186 = vmatpush3.bf16.msra.mxu1 %v6786_v16  ;;  %3752 = vmatprep.mubr.f32.mxu1 %v6759_v24 }
 0x1e3   :  { %1863 = vmatprep.mubr.f32.mxu0 %v6577_v48  ;;  %4188 = vmatprep.subr.bf16.mxu1 %v6790_v12 }
 0x1e4   :  { %v6178_v7 = vpop.f32.mrb[12].mxu1 }
 0x1e5   :  { %v6180_v4 = vpop.f32.mrb[13].mxu1  ;;  %1865 = vmatmul.mubr.f32.gmra.mrb[10].mxu0 %v6758_v41  ;;  %3753 = vmatmul.mubr.f32.gmra.mrb[38].mxu1 %v6765_v3 }
 0x1e6   :  { %4190 = vmatpush3.bf16.msra.mxu1 %v6790_v12  ;;  %3755 = vmatprep.mubr.f32.mxu1 %v6766_v15 }
 0x1e7   :  { %1870 = vmatprep.mubr.f32.mxu0 %v6577_v48  ;;  %4192 = vmatprep.subr.bf16.mxu1 %v6794_v55 }
 0x1e8   :  { %v6188_v16 = vpop.f32.mrb[14].mxu1 }
 0x1e9   :  { %v6190_v40 = vpop.f32.mrb[15].mxu1  ;;  %1872 = vmatmul.mubr.f32.gmra.mrb[12].mxu0 %v6759_v24  ;;  %3756 = vmatmul.mubr.f32.gmra.mrb[40].mxu1 %v6772_v50 }
 0x1ea   :  { %4194 = vmatpush3.bf16.msra.mxu1 %v6794_v55  ;;  %3758 = vmatprep.mubr.f32.mxu1 %v6773_v59 }
 0x1eb   :  { %1877 = vmatprep.mubr.f32.mxu0 %v6577_v48  ;;  %4196 = vmatprep.subr.bf16.mxu1 %v6798_v13 }
 0x1ed   :  { %1879 = vmatmul.mubr.f32.gmra.mrb[14].mxu0 %v6765_v3  ;;  %3759 = vmatmul.mubr.f32.gmra.mrb[42].mxu1 %v5444_v5 }
 0x1ee   :  { %4198 = vmatpush3.bf16.msra.mxu1 %v6798_v13  ;;  %3761 = vmatprep.mubr.f32.mxu1 %v5477_v21 }
 0x1ef   :  { %1884 = vmatprep.mubr.f32.mxu0 %v6577_v48  ;;  %4200 = vmatprep.subr.bf16.mxu1 %v5718_v22 }
 0x1f1   :  { %1886 = vmatmul.mubr.f32.gmra.mrb[16].mxu0 %v6766_v15  ;;  %3762 = vmatmul.mubr.f32.gmra.mrb[44].mxu1 %v5499_v39 }
 0x1f2   :  { %4202 = vmatpush3.bf16.msra.mxu1 %v5718_v22  ;;  %3764 = vmatprep.mubr.f32.mxu1 %v5525_v6 }
 0x1f3   :  { %1891 = vmatprep.mubr.f32.mxu0 %v6577_v48  ;;  %4204 = vmatprep.subr.bf16.mxu1 %v5758_v31 }
 0x1f5   :  { %1893 = vmatmul.mubr.f32.gmra.mrb[18].mxu0 %v6772_v50  ;;  %3765 = vmatmul.mubr.f32.gmra.mrb[46].mxu1 %v5544_v11 }
 0x1f6   :  { %4206 = vmatpush3.bf16.msra.mxu1 %v5758_v31  ;;  %3799 = vmatprep.mubr.f32.mxu1 %v6738_v20 }
 0x1f7   :  { %1898 = vmatprep.mubr.f32.mxu0 %v6577_v48 }
 0x1f9   :  { %1900 = vmatmul.mubr.f32.gmra.mrb[20].mxu0 %v6773_v59  ;;  %3800 = vmatmul.mubr.f32.vlgmr.msra.gmra.mrb[32].mxu1 %v6744_v47 }
 0x1fa   :  { %3802 = vmatprep.mubr.f32.mxu1 %v6745_v63  ;;  %1905 = vmatprep.mubr.f32.mxu0 %v6577_v48 }
 0x1fd   :  { %1907 = vmatmul.mubr.f32.gmra.mrb[22].mxu0 %v5444_v5  ;;  %3803 = vmatmul.mubr.f32.gmra.mrb[34].mxu1 %v6751_v52 }
 0x1fe   :  { %3805 = vmatprep.mubr.f32.mxu1 %v6752_v10  ;;  %1912 = vmatprep.mubr.f32.mxu0 %v6577_v48 }
 0x201   :  { %1914 = vmatmul.mubr.f32.gmra.mrb[24].mxu0 %v5477_v21  ;;  %3806 = vmatmul.mubr.f32.gmra.mrb[36].mxu1 %v6758_v41 }
 0x202   :  { %3808 = vmatprep.mubr.f32.mxu1 %v6759_v24  ;;  %1919 = vmatprep.mubr.f32.mxu0 %v6577_v48 }
 0x205   :  { %1921 = vmatmul.mubr.f32.gmra.mrb[26].mxu0 %v5499_v39  ;;  %3809 = vmatmul.mubr.f32.gmra.mrb[38].mxu1 %v6765_v3 }
 0x206   :  { %3811 = vmatprep.mubr.f32.mxu1 %v6766_v15  ;;  %1926 = vmatprep.mubr.f32.mxu0 %v6577_v48 }
 0x209   :  { %1928 = vmatmul.mubr.f32.gmra.mrb[28].mxu0 %v5525_v6  ;;  %3812 = vmatmul.mubr.f32.gmra.mrb[40].mxu1 %v6772_v50 }
 0x20a   :  { %3814 = vmatprep.mubr.f32.mxu1 %v6773_v59  ;;  %1933 = vmatprep.mubr.f32.mxu0 %v6577_v48 }
 0x20c   :  { %v6235_v22 = vpop.f32.mrb[16].mxu1 }
 0x20d   :  { %v6237_v31 = vpop.f32.mrb[17].mxu1  ;;  %1935 = vmatmul.mubr.f32.gmra.mrb[30].mxu0 %v5544_v11  ;;  %3815 = vmatmul.mubr.f32.gmra.mrb[42].mxu1 %v5444_v5 }
 0x20e   :  { %3817 = vmatprep.mubr.f32.mxu1 %v5477_v21 }
 0x210   :  { %v6242_v20 = vpop.f32.mrb[18].mxu1 }
 0x211   :  { %v6244_v47 = vpop.f32.mrb[19].mxu1  ;;  %3818 = vmatmul.mubr.f32.gmra.mrb[44].mxu1 %v5499_v39 }
 0x212   :  { %3820 = vmatprep.mubr.f32.mxu1 %v5525_v6 }
 0x214   :  { %v6248_v63 = vpop.f32.mrb[20].mxu1 }
 0x215   :  { %v6250_v48 = vpop.f32.mrb[21].mxu1  ;;  %3821 = vmatmul.mubr.f32.gmra.mrb[46].mxu1 %v5544_v11 }
 0x218   :  { %v6253_v52 = vpop.f32.mrb[22].mxu1 }
 0x219   :  { %v6255_v10 = vpop.f32.mrb[23].mxu1 }
 0x21c   :  { %v6257_v5 = vpop.f32.mrb[24].mxu1 }
 0x21d   :  { %v6259_v21 = vpop.f32.mrb[25].mxu1 }
 0x220   :  { %v6261_v41 = vpop.f32.mrb[26].mxu1 }
 0x221   :  { %v6263_v24 = vpop.f32.mrb[27].mxu1 }
 0x224   :  { %v6265_v39 = vpop.f32.mrb[28].mxu1 }
 0x225   :  { %v6267_v6 = vpop.f32.mrb[29].mxu1 }
 0x228   :  { %v6269_v3 = vpop.f32.mrb[30].mxu1 }
 0x229   :  { %v6271_v15 = vpop.f32.mrb[31].mxu1 }
 0x2a4   :  { %v1831_v11 = vpop.f32.mrb[0].mxu0 }
 0x2a5   :  { %v4223_v50 = vadd.f32 %v1831_v11, %v6118_v33  ;;  %v1833_v59 = vpop.f32.mrb[1].mxu0 }
 0x2a6   :  { %v4224_v12 = vadd.f32 %v1833_v59, %v6121_v35 }
 0x2a7   :  { %3227 = vst [vmem:[#allocation11] sm:$0xff] %v4223_v50 }
 0x2a8   :  { %3228 = vst [vmem:[#allocation11 + $0x8] sm:$0xff] %v4224_v12  ;;  %v1838_v55 = vpop.f32.mrb[2].mxu0 }
 0x2a9   :  { %v4225_v13 = vadd.f32 %v1838_v55, %v6131_v26  ;;  %v1840_v14 = vpop.f32.mrb[3].mxu0 }
 0x2aa   :  { %v4226_v0 = vadd.f32 %v1840_v14, %v6133_v19 }
 0x2ab   :  { %3230 = vst [vmem:[#allocation11 + $0x18] sm:$0xff] %v4225_v13 }
 0x2ac   :  { %3231 = vst [vmem:[#allocation11 + $0x20] sm:$0xff] %v4226_v0  ;;  %v1845_v61 = vpop.f32.mrb[4].mxu0 }
 0x2ad   :  { %v4227_v57 = vadd.f32 %v1845_v61, %v6139_v42  ;;  %v1847_v32 = vpop.f32.mrb[5].mxu0 }
 0x2ae   :  { %v4228_v44 = vadd.f32 %v1847_v32, %v6141_v28 }
 0x2af   :  { %3233 = vst [vmem:[#allocation11 + $0x30] sm:$0xff] %v4227_v57 }
 0x2b0   :  { %3234 = vst [vmem:[#allocation11 + $0x38] sm:$0xff] %v4228_v44  ;;  %v1852_v1 = vpop.f32.mrb[6].mxu0 }
 0x2b1   :  { %v4229_v38 = vadd.f32 %v1852_v1, %v6148_v34  ;;  %v1854_v36 = vpop.f32.mrb[7].mxu0 }
 0x2b2   :  { %v4230_v27 = vadd.f32 %v1854_v36, %v6150_v29 }
 0x2b3   :  { %3236 = vst [vmem:[#allocation11 + $0x48] sm:$0xff] %v4229_v38 }
 0x2b4   :  { %3237 = vst [vmem:[#allocation11 + $0x50] sm:$0xff] %v4230_v27  ;;  %v1859_v49 = vpop.f32.mrb[8].mxu0 }
 0x2b5   :  { %v4231_v43 = vadd.f32 %v1859_v49, %v6158_v58  ;;  %v1861_v37 = vpop.f32.mrb[9].mxu0 }
 0x2b6   :  { %v4232_v46 = vadd.f32 %v1861_v37, %v6160_v56 }
 0x2b7   :  { %3239 = vst [vmem:[#allocation11 + $0x60] sm:$0xff] %v4231_v43 }
 0x2b8   :  { %3240 = vst [vmem:[#allocation11 + $0x68] sm:$0xff] %v4232_v46  ;;  %v1866_v18 = vpop.f32.mrb[10].mxu0 }
 0x2b9   :  { %v4233_v23 = vadd.f32 %v1866_v18, %v6168_v62  ;;  %v1868_v45 = vpop.f32.mrb[11].mxu0 }
 0x2ba   :  { %v4234_v9 = vadd.f32 %v1868_v45, %v6170_v17 }
 0x2bb   :  { %3242 = vst [vmem:[#allocation11 + $0x78] sm:$0xff] %v4233_v23 }
 0x2bc   :  { %3243 = vst [vmem:[#allocation11 + $0x80] sm:$0xff] %v4234_v9  ;;  %v1873_v51 = vpop.f32.mrb[12].mxu0 }
 0x2bd   :  { %v4235_v30 = vadd.f32 %v1873_v51, %v6178_v7  ;;  %v1875_v8 = vpop.f32.mrb[13].mxu0 }
 0x2be   :  { %v4236_v53 = vadd.f32 %v1875_v8, %v6180_v4 }
 0x2bf   :  { %3245 = vst [vmem:[#allocation11 + $0x90] sm:$0xff] %v4235_v30 }
 0x2c0   :  { %3246 = vst [vmem:[#allocation11 + $0x98] sm:$0xff] %v4236_v53  ;;  %v1880_v33 = vpop.f32.mrb[14].mxu0 }
 0x2c1   :  { %v4237_v54 = vadd.f32 %v1880_v33, %v6188_v16  ;;  %v1882_v35 = vpop.f32.mrb[15].mxu0 }
 0x2c2   :  { %v4238_v60 = vadd.f32 %v1882_v35, %v6190_v40 }
 0x2c3   :  { %3248 = vst [vmem:[#allocation11 + $0xa8] sm:$0xff] %v4237_v54 }
 0x2c4   :  { %3249 = vst [vmem:[#allocation11 + $0xb0] sm:$0xff] %v4238_v60  ;;  %v1887_v25 = vpop.f32.mrb[16].mxu0 }
 0x2c5   :  { %v4239_v2 = vadd.f32 %v1887_v25, %v6235_v22  ;;  %v1889_v26 = vpop.f32.mrb[17].mxu0 }
 0x2c6   :  { %v4240_v19 = vadd.f32 %v1889_v26, %v6237_v31 }
 0x2c7   :  { %3251 = vst [vmem:[#allocation11 + $0xc0] sm:$0xff] %v4239_v2 }
 0x2c8   :  { %3252 = vst [vmem:[#allocation11 + $0xc8] sm:$0xff] %v4240_v19  ;;  %v1894_v42 = vpop.f32.mrb[18].mxu0 }
 0x2c9   :  { %v4241_v28 = vadd.f32 %v1894_v42, %v6242_v20  ;;  %v1896_v34 = vpop.f32.mrb[19].mxu0 }
 0x2ca   :  { %v4242_v29 = vadd.f32 %v1896_v34, %v6244_v47 }
 0x2cb   :  { %3254 = vst [vmem:[#allocation11 + $0xd8] sm:$0xff] %v4241_v28 }
 0x2cc   :  { %3255 = vst [vmem:[#allocation11 + $0xe0] sm:$0xff] %v4242_v29  ;;  %v1901_v58 = vpop.f32.mrb[20].mxu0  ;;  %v3801_v56 = vpop.f32.mrb[32].mxu1 }
 0x2cd   :  { %v4243_v62 = vadd.f32 %v1901_v58, %v6248_v63  ;;  %3232 = vst [vmem:[#allocation11 + $0x28] sm:$0xff] %v3801_v56  ;;  %v1903_v17 = vpop.f32.mrb[21].mxu0  ;;  %v3133_v7 = vpop.f32.mrb[33].mxu1 }
 0x2ce   :  { %v4244_v4 = vadd.f32 %v1903_v17, %v6250_v48  ;;  %3229 = vst [vmem:[#allocation11 + $0x10] sm:$0xff] %v3133_v7 }
 0x2cf   :  { %3257 = vst [vmem:[#allocation11 + $0xf0] sm:$0xff] %v4243_v62 }
 0x2d0   :  { %3258 = vst [vmem:[#allocation11 + $0xf8] sm:$0xff] %v4244_v4  ;;  %v1908_v16 = vpop.f32.mrb[22].mxu0  ;;  %v3804_v40 = vpop.f32.mrb[34].mxu1 }
 0x2d1   :  { %v4245_v22 = vadd.f32 %v1908_v16, %v6253_v52  ;;  %3238 = vst [vmem:[#allocation11 + $0x58] sm:$0xff] %v3804_v40  ;;  %v1910_v31 = vpop.f32.mrb[23].mxu0  ;;  %v3145_v20 = vpop.f32.mrb[35].mxu1 }
 0x2d2   :  { %v4246_v47 = vadd.f32 %v1910_v31, %v6255_v10  ;;  %3235 = vst [vmem:[#allocation11 + $0x40] sm:$0xff] %v3145_v20 }
 0x2d3   :  { %3260 = vst [vmem:[#allocation11 + $0x108] sm:$0xff] %v4245_v22 }
 0x2d4   :  { %3261 = vst [vmem:[#allocation11 + $0x110] sm:$0xff] %v4246_v47  ;;  %v1915_v63 = vpop.f32.mrb[24].mxu0  ;;  %v3807_v11 = vpop.f32.mrb[36].mxu1 }
 0x2d5   :  { %v4247_v50 = vadd.f32 %v1915_v63, %v6257_v5  ;;  %3244 = vst [vmem:[#allocation11 + $0x88] sm:$0xff] %v3807_v11  ;;  %v1917_v48 = vpop.f32.mrb[25].mxu0  ;;  %v3157_v59 = vpop.f32.mrb[37].mxu1 }
 0x2d6   :  { %v4248_v12 = vadd.f32 %v1917_v48, %v6259_v21  ;;  %3241 = vst [vmem:[#allocation11 + $0x70] sm:$0xff] %v3157_v59 }
 0x2d7   :  { %3263 = vst [vmem:[#allocation11 + $0x120] sm:$0xff] %v4247_v50 }
 0x2d8   :  { %3264 = vst [vmem:[#allocation11 + $0x128] sm:$0xff] %v4248_v12  ;;  %v1922_v52 = vpop.f32.mrb[26].mxu0  ;;  %v3810_v55 = vpop.f32.mrb[38].mxu1 }
 0x2d9   :  { %v4249_v13 = vadd.f32 %v1922_v52, %v6261_v41  ;;  %3250 = vst [vmem:[#allocation11 + $0xb8] sm:$0xff] %v3810_v55  ;;  %v1924_v10 = vpop.f32.mrb[27].mxu0  ;;  %v3169_v14 = vpop.f32.mrb[39].mxu1 }
 0x2da   :  { %v4250_v0 = vadd.f32 %v1924_v10, %v6263_v24  ;;  %3247 = vst [vmem:[#allocation11 + $0xa0] sm:$0xff] %v3169_v14 }
 0x2db   :  { %3266 = vst [vmem:[#allocation11 + $0x138] sm:$0xff] %v4249_v13 }
 0x2dc   :  { %3267 = vst [vmem:[#allocation11 + $0x140] sm:$0xff] %v4250_v0  ;;  %v1929_v5 = vpop.f32.mrb[28].mxu0  ;;  %v3813_v61 = vpop.f32.mrb[40].mxu1 }
 0x2dd   :  { %v4251_v57 = vadd.f32 %v1929_v5, %v6265_v39  ;;  %3256 = vst [vmem:[#allocation11 + $0xe8] sm:$0xff] %v3813_v61  ;;  %v1931_v21 = vpop.f32.mrb[29].mxu0  ;;  %v3181_v32 = vpop.f32.mrb[41].mxu1 }
 0x2de   :  { %v4252_v44 = vadd.f32 %v1931_v21, %v6267_v6  ;;  %3253 = vst [vmem:[#allocation11 + $0xd0] sm:$0xff] %v3181_v32 }
 0x2df   :  { %3269 = vst [vmem:[#allocation11 + $0x150] sm:$0xff] %v4251_v57 }
 0x2e0   :  { %3270 = vst [vmem:[#allocation11 + $0x158] sm:$0xff] %v4252_v44  ;;  %v1936_v41 = vpop.f32.mrb[30].mxu0  ;;  %v3816_v1 = vpop.f32.mrb[42].mxu1 }
 0x2e1   :  { %v4253_v38 = vadd.f32 %v1936_v41, %v6269_v3  ;;  %3262 = vst [vmem:[#allocation11 + $0x118] sm:$0xff] %v3816_v1  ;;  %v1938_v24 = vpop.f32.mrb[31].mxu0  ;;  %v3193_v36 = vpop.f32.mrb[43].mxu1 }
 0x2e2   :  { %v4254_v27 = vadd.f32 %v1938_v24, %v6271_v15  ;;  %3259 = vst [vmem:[#allocation11 + $0x100] sm:$0xff] %v3193_v36 }
 0x2e3   :  { %3272 = vst [vmem:[#allocation11 + $0x168] sm:$0xff] %v4253_v38 }
 0x2e4   :  { %3273 = vst [vmem:[#allocation11 + $0x170] sm:$0xff] %v4254_v27  ;;  %v3819_v39 = vpop.f32.mrb[44].mxu1 }
 0x2e5   :  { %3268 = vst [vmem:[#allocation11 + $0x148] sm:$0xff] %v3819_v39  ;;  %v3205_v49 = vpop.f32.mrb[45].mxu1 }
 0x2e6   :  { %3265 = vst [vmem:[#allocation11 + $0x130] sm:$0xff] %v3205_v49 }
 0x2e8   :  { %v3822_v6 = vpop.f32.mrb[46].mxu1 }
 0x2e9   :  { %3274 = vst [vmem:[#allocation11 + $0x178] sm:$0xff] %v3822_v6  ;;  %v3217_v43 = vpop.f32.mrb[47].mxu1 }
 0x2ea   :  { %3271 = vst [vmem:[#allocation11 + $0x160] sm:$0xff] %v3217_v43 }
 0x2eb   :  { %4592 = shalt.err (!%p4589_p3)
}
 0x2ec   :  { %s4593_s15 = scalar_lea.hbm %s6324_s4, 6144 }
 0x2ed   :  { %p4594_p4 = scmp.ne.s32.totalorder %s6324_s4, %s4593_s15  ;;  %p4597_p5 = scmp.lt.u32.totalorder %s4593_s15, %s6324_s4 }
 0x2ef   :  { %p4599_p6 = pnand %p4597_p5, %p4594_p4 }
 0x2f1   :  { %4602 = shalt.err (!%p4599_p6)
}
 0x2f2   :  { %3286 = dma.vmem_to_hbm [thread:$0]  %s3281_s12, 6144, %s6324_s4, [#allocation5], %s4617_s1, %s4617_s1, %s4618_s18  }
 0x2f3   :  { %4609 = dma.done.wait [#allocation5], 6144  }
 0x2f4   :  { %4610 = vsyncadd [#allocation5], 4294961152 }
 0x2f5   :  { %3290 = vsyncpa [#allocation4], 1 }
 0x2f6   :  { %3291 = vsyncpa [#allocation9], 1 }
 0x2f7   :  { %3292 = vsyncpa [#allocation5], 1 }
 0x2f8   :  { %3293 = vsyncpa [#allocation6], 1 }

</bundles_post_ra>
